<compile_context>
chip_gen: v6e
topology: v6e:2x2x1
jax: 0.10.0
libtpu: 0.0.40
codegen_flags: <defaults>
</compile_context>

<pallas_src>
import math

import jax
import jax.numpy as jnp
from jax import lax
from jax.experimental import pallas as pl
from jax.experimental.pallas import tpu as pltpu

# --- small synthetic RoBERTa config ------------------------------------------
B, S, H = 2, 8, 32            # batch, sequence, hidden size
NH, L, I = 2, 2, 64           # attention heads, encoder layers, intermediate
DH = H // NH
VOCAB, MAXPOS, TYPES = 100, 64, 1
PAD_ID = 1
LN_EPS = 1e-12
_INV_SQRT2 = 0.7071067811865476
_ATTN_SCALE = 1.0 / math.sqrt(DH)
OUTW = 128                    # lane-dense output width (cols 0..2 are the logits)

# packed-vector buffer row layout (single (PVEC_ROWS,128) f32 input):
#   row 0/1                    : embedding LayerNorm gamma / beta          (H)
#   per layer l, base=2+13*l   :
#       base+3h+{0,1,2}        : per-head q / k / v bias                   (DH)
#       base+3*NH+0            : attention output bias                     (H)
#       base+3*NH+{1,2}        : LN1 gamma / beta                          (H)
#       base+3*NH+3            : FFN intermediate bias                     (I)
#       base+3*NH+4            : FFN output bias                           (H)
#       base+3*NH+{5,6}        : LN2 gamma / beta                          (H)
#   last used row              : conv-head biases (head, tail, seg, 0...)  (128)
_R_EMB_G, _R_EMB_B = 0, 1
_ROWS_PER_LAYER = 3 * NH + 7
_R_LAYER0 = 2
_R_CONV_B = _R_LAYER0 + L * _ROWS_PER_LAYER
PVEC_ROWS = ((_R_CONV_B + 1 + 7) // 8) * 8


def _layer_norm(x, g, b):
    mu = jnp.mean(x, axis=-1, keepdims=True)
    xc = x - mu
    var = jnp.mean(xc * xc, axis=-1, keepdims=True)
    return xc * lax.rsqrt(var + LN_EPS) * g + b


# -----------------------------------------------------------------------------
# fused forward kernel: one batch element per grid step
# -----------------------------------------------------------------------------
def _fused_forward_kernel(emb_ref, amask_ref, stm_ref,
                          wqkv_ref, wo_ref, wffn_ref, wconv_ref, pvec_ref,
                          out_ref):
    def vrow(r, w):                               # (1, w) row of the packed buffer
        return pvec_ref[r:r + 1, :w]

    # additive attention bias from the raw 0/1 mask: (m - 1) * 1e9  -> 0 / -1e9
    attn_bias = (amask_ref[0] - 1.0) * 1e9                              # (1, S)

    x = _layer_norm(emb_ref[...], vrow(_R_EMB_G, H), vrow(_R_EMB_B, H))  # (S, H)

    # TODO(synk): at real RoBERTa depth replace this static unroll with a grid
    # axis over layers ('arbitrary') and streamed per-layer weight blocks — the
    # fully VMEM-resident single-call design only fits at toy sizes (v7x: 64 MiB).
    for l in range(L):
        base = _R_LAYER0 + l * _ROWS_PER_LAYER
        attn = jnp.zeros((S, H), jnp.float32)
        for h in range(NH):
            widx = 3 * (NH * l + h)
            brow = base + 3 * h
            q = jnp.dot(x, wqkv_ref[widx + 0],
                        preferred_element_type=jnp.float32) + vrow(brow + 0, DH)
            k = jnp.dot(x, wqkv_ref[widx + 1],
                        preferred_element_type=jnp.float32) + vrow(brow + 1, DH)
            v = jnp.dot(x, wqkv_ref[widx + 2],
                        preferred_element_type=jnp.float32) + vrow(brow + 2, DH)
            # q @ k^T (contraction on both last dims == trans_b form)
            s = lax.dot_general(q, k, (((1,), (1,)), ((), ())),
                                preferred_element_type=jnp.float32)      # (S, S)
            s = s * _ATTN_SCALE + attn_bias
            s = s - jnp.max(s, axis=-1, keepdims=True)
            p = jnp.exp(s)
            p = p / jnp.sum(p, axis=-1, keepdims=True)   # exact normalizer
            ctx = jnp.dot(p, v, preferred_element_type=jnp.float32)      # (S, DH)
            attn = attn + jnp.dot(ctx, wo_ref[NH * l + h],
                                  preferred_element_type=jnp.float32)    # (S, H)
        attn = attn + vrow(base + 3 * NH, H)
        x = _layer_norm(attn + x, vrow(base + 3 * NH + 1, H),
                        vrow(base + 3 * NH + 2, H))

        inter = (jnp.dot(x, wffn_ref[l, :H, :],
                         preferred_element_type=jnp.float32)
                 + vrow(base + 3 * NH + 3, I))
        inter = 0.5 * inter * (1.0 + lax.erf(inter * _INV_SQRT2))        # exact GELU
        ffn = (jnp.dot(inter, wffn_ref[l, H:, :H],
                       preferred_element_type=jnp.float32)
               + vrow(base + 3 * NH + 4, H))
        x = _layer_norm(ffn + x, vrow(base + 3 * NH + 5, H),
                        vrow(base + 3 * NH + 6, H))

    # fused Conv1d(k=2, pad=1) heads: logits[t] = x[t]·Wcur + x[t-1]·Wprev + b,
    # with x[-1] == 0.  Wcur / Wprev are packed side-by-side so x hits the MXU
    # once; the "previous token" term reuses that product via the sub-diagonal
    # shift (shift @ (x @ Wprev) == (shift @ x) @ Wprev).
    xw = jnp.dot(x, wconv_ref[...], preferred_element_type=jnp.float32)  # (S, 2*OUTW)
    r = lax.broadcasted_iota(jnp.int32, (S, S), 0)
    c = lax.broadcasted_iota(jnp.int32, (S, S), 1)
    shift = (r == c + 1).astype(jnp.float32)                             # (S, S)
    logits = (xw[:, :OUTW]
              + jnp.dot(shift, xw[:, OUTW:], preferred_element_type=jnp.float32)
              + vrow(_R_CONV_B, OUTW))                                   # (S, OUTW)
    # special-token masking, exactly as torch `.where(mask == 0, -inf)`
    out_ref[...] = jnp.where(stm_ref[...] == 0.0, logits, jnp.float32(-jnp.inf))


# -----------------------------------------------------------------------------
# wrapper: embedding gathers / tiny mask packing are glue; the rest is one kernel
# -----------------------------------------------------------------------------
def forward(params, input_ids, attention_mask=None, token_type_ids=None,
            special_tokens_mask=None):
    if attention_mask is None:
        attention_mask = jnp.ones_like(input_ids)
    if token_type_ids is None:
        token_type_ids = jnp.zeros_like(input_ids)
    if special_tokens_mask is None:
        special_tokens_mask = jnp.zeros_like(input_ids)   # zeros == no masking

    # RoBERTa position ids (padding_idx = 1); embedding gathers stay in XLA (glue)
    pad_mask = (input_ids != PAD_ID).astype(jnp.int32)
    position_ids = jnp.cumsum(pad_mask, axis=1) * pad_mask + PAD_ID
    emb = (params["word_emb"][input_ids]
           + params["pos_emb"][position_ids]
           + params["type_emb"][token_type_ids]).reshape(B * S, H)

    amask = attention_mask.astype(jnp.float32).reshape(B, 1, S)

    # per-column special-token masks for the lane-dense logits block:
    # col 0 = head mask, col 1 = tail mask (rolled right by one as in torch),
    # cols 2.. = 0 (segmentation head is never masked).
    stm = special_tokens_mask.astype(jnp.float32)
    stm_tail = jnp.concatenate([stm[:, -1:], stm[:, :-1]], axis=1)
    stm128 = jnp.pad(jnp.stack([stm, stm_tail], axis=-1),
                     ((0, 0), (0, 0), (0, OUTW - 2))).reshape(B * S, OUTW)

    out = pl.pallas_call(
        _fused_forward_kernel,
        grid=(B,),
        in_specs=[
            pl.BlockSpec((S, H), lambda b: (b, 0)),                 # embeddings
            pl.BlockSpec((1, 1, S), lambda b: (b, 0, 0)),           # attention mask
            pl.BlockSpec((S, OUTW), lambda b: (b, 0)),              # special-token mask
            pl.BlockSpec((3 * NH * L, H, DH), lambda b: (0, 0, 0)),  # per-head Q/K/V
            pl.BlockSpec((NH * L, DH, H), lambda b: (0, 0, 0)),      # per-head attn out
            pl.BlockSpec((L, H + I, I), lambda b: (0, 0, 0)),        # FFN wi|wo2
            pl.BlockSpec((H, 2 * OUTW), lambda b: (0, 0)),           # conv Wcur|Wprev
            pl.BlockSpec((PVEC_ROWS, 128), lambda b: (0, 0)),        # packed vectors
        ],
        out_specs=pl.BlockSpec((S, OUTW), lambda b: (b, 0)),
        out_shape=jax.ShapeDtypeStruct((B * S, OUTW), jnp.float32),
        compiler_params=pltpu.CompilerParams(
            dimension_semantics=("parallel",)),      # batch -> both TCs on v7x
    )(emb, amask, stm128,
      params["w_qkvh"], params["w_oh"], params["w_ffn"], params["w_conv"],
      params["pvec"])

    logits = out.reshape(B, S, OUTW)[..., :3]
    # torch: dropout(0.2) before the convs is identity in eval mode.
    return ((logits[..., 0], logits[..., 1], logits[..., 2]),)


# -----------------------------------------------------------------------------
# deterministic parameter init (synthetic; no checkpoint loading).
# All weight packing (per-head splits, FFN merge, conv tap reorder, bias rows)
# is hoisted here and runs once.
# -----------------------------------------------------------------------------
def init_params(key):
    keys = iter(jax.random.split(key, 64))

    def nrm(shape, s=0.02):
        return jax.random.normal(next(keys), shape, jnp.float32) * s

    word_emb = nrm((VOCAB, H))
    pos_emb = nrm((MAXPOS, H))
    type_emb = nrm((TYPES, H))

    # encoder weights (full matrices), then split per head
    wq, wk, wv = nrm((L, H, H)), nrm((L, H, H)), nrm((L, H, H))
    wo = nrm((L, H, H))
    wi, wo2 = nrm((L, H, I)), nrm((L, I, H))
    bq, bk, bv = nrm((L, H)), nrm((L, H)), nrm((L, H))
    bo, bi_b, bo2 = nrm((L, H)), nrm((L, I)), nrm((L, H))

    def split_heads(w):                       # (L, H, H) -> (L, NH, H, DH)
        return w.reshape(L, H, NH, DH).transpose(0, 2, 1, 3)

    w_qkvh = jnp.stack([split_heads(wq), split_heads(wk), split_heads(wv)],
                       axis=2).reshape(3 * NH * L, H, DH)       # [3*(NH*l+h)+c]
    w_oh = wo.reshape(L, NH, DH, H).reshape(NH * L, DH, H)      # [NH*l+h]

    # merged FFN buffer: rows 0..H-1 = wi (H,I), rows H.. = wo2 (I,H) in cols :H
    w_ffn = jnp.concatenate(
        [wi, jnp.pad(wo2, ((0, 0), (0, 0), (0, I - H)))], axis=1)  # (L, H+I, I)

    # Conv1d(H, 1, kernel=2, padding=1) heads; torch weight[0] is (H, 2):
    # head/seg (conv then [:, :-1]): cur tap = w[:,1], prev tap = w[:,0].
    # tail (flip, conv, [:, 1:], flip): cur tap = w[:,0], prev tap = w[:,1].
    w_h, w_t, w_s = nrm((H, 2), 0.1), nrm((H, 2), 0.1), nrm((H, 2), 0.1)
    b_h = jax.random.normal(next(keys), (), jnp.float32) * 0.1
    b_t = jax.random.normal(next(keys), (), jnp.float32) * 0.1
    b_s = jax.random.normal(next(keys), (), jnp.float32) * 0.1
    wcur = jnp.stack([w_h[:, 1], w_t[:, 0], w_s[:, 1]], axis=1)   # (H, 3)
    wprev = jnp.stack([w_h[:, 0], w_t[:, 1], w_s[:, 0]], axis=1)  # (H, 3)
    w_conv = jnp.concatenate([jnp.pad(wcur, ((0, 0), (0, OUTW - 3))),
                              jnp.pad(wprev, ((0, 0), (0, OUTW - 3)))],
                             axis=1)                              # (H, 2*OUTW)

    # packed vector buffer (biases + LayerNorm params) — one DMA for ~25 vectors
    def row(v):
        v = jnp.asarray(v, jnp.float32).reshape(-1)
        return jnp.pad(v, (0, 128 - v.shape[0]))

    rows = [row(jnp.ones((H,))), row(jnp.zeros((H,)))]            # emb LN g/b
    for l in range(L):
        for h in range(NH):
            sl = slice(h * DH, (h + 1) * DH)
            rows += [row(bq[l, sl]), row(bk[l, sl]), row(bv[l, sl])]
        rows += [row(bo[l]),
                 row(jnp.ones((H,))), row(jnp.zeros((H,))),       # LN1 g/b
                 row(bi_b[l]), row(bo2[l]),
                 row(jnp.ones((H,))), row(jnp.zeros((H,)))]       # LN2 g/b
    rows.append(row(jnp.stack([b_h, b_t, b_s])))                  # conv biases
    while len(rows) < PVEC_ROWS:
        rows.append(jnp.zeros((128,), jnp.float32))
    pvec = jnp.stack(rows)                                        # (PVEC_ROWS, 128)

    return {"word_emb": word_emb, "pos_emb": pos_emb, "type_emb": type_emb,
            "w_qkvh": w_qkvh, "w_oh": w_oh, "w_ffn": w_ffn,
            "w_conv": w_conv, "pvec": pvec}


if __name__ == "__main__":
    key = jax.random.PRNGKey(0)
    pkey, ikey = jax.random.split(key)
    params = init_params(pkey)

    input_ids = jax.random.randint(ikey, (B, S), 2, VOCAB)      # avoid pad id
    attention_mask = jnp.ones((B, S), jnp.int32)
    token_type_ids = jnp.zeros((B, S), jnp.int32)
    special_tokens_mask = (jnp.zeros((B, S), jnp.int32)
                           .at[:, 0].set(1).at[:, -1].set(1))   # <s>, </s>

    outputs = jax.jit(forward)(params, input_ids, attention_mask,
                               token_type_ids, special_tokens_mask)
    logits_head, logits_tail, logits_segmentation = outputs[0]
    jax.block_until_ready((logits_head, logits_tail, logits_segmentation))

    assert logits_head.shape == (B, S)
    assert logits_tail.shape == (B, S)
    assert logits_segmentation.shape == (B, S)
    print("KERNEL_OK")
</pallas_src>

<mosaic_0001>
module attributes {stable_mosaic.version = 11 : i64} {
  func.func @_fused_forward_kernel(%arg0: i32, %arg1: memref<8x32xf32, #tpu.memory_space<vmem>>, %arg2: memref<1x1x8xf32, #tpu.memory_space<vmem>>, %arg3: memref<8x128xf32, #tpu.memory_space<vmem>>, %arg4: memref<12x32x16xf32, #tpu.memory_space<vmem>>, %arg5: memref<4x16x32xf32, #tpu.memory_space<vmem>>, %arg6: memref<2x96x64xf32, #tpu.memory_space<vmem>>, %arg7: memref<32x256xf32, #tpu.memory_space<vmem>>, %arg8: memref<32x128xf32, #tpu.memory_space<vmem>>, %arg9: memref<8x128xf32, #tpu.memory_space<vmem>>) attributes {dimension_semantics = [#tpu.dimension_semantics<parallel>], iteration_bounds = array<i64: 2>, scalar_prefetch = 0 : i64, scratch_operands = 0 : i64, tpu.core_type = #tpu.core_type<tc>, window_params = [{transform_indices = @transform_0, window_bounds = array<i64: 8, 32>}, {transform_indices = @transform_1, window_bounds = array<i64: 1, 1, 8>}, {transform_indices = @transform_2, window_bounds = array<i64: 8, 128>}, {pipeline_mode = #tpu.pipeline_mode<synchronous>, transform_indices = @transform_3, window_bounds = array<i64: 12, 32, 16>}, {pipeline_mode = #tpu.pipeline_mode<synchronous>, transform_indices = @transform_4, window_bounds = array<i64: 4, 16, 32>}, {pipeline_mode = #tpu.pipeline_mode<synchronous>, transform_indices = @transform_5, window_bounds = array<i64: 2, 96, 64>}, {pipeline_mode = #tpu.pipeline_mode<synchronous>, transform_indices = @transform_6, window_bounds = array<i64: 32, 256>}, {pipeline_mode = #tpu.pipeline_mode<synchronous>, transform_indices = @transform_7, window_bounds = array<i64: 32, 128>}, {transform_indices = @transform_8, window_bounds = array<i64: 8, 128>}]} {
    %c0 = arith.constant 0 : index
    %c0_0 = arith.constant 0 : index
    %c0_1 = arith.constant 0 : index
    %0 = vector.load %arg2[%c0, %c0_0, %c0_1] : memref<1x1x8xf32, #tpu.memory_space<vmem>>, vector<1x1x8xf32>
    %1 = vector.shape_cast %0 : vector<1x1x8xf32> to vector<1x8xf32>
    %cst = arith.constant 1.000000e+00 : f32
    %2 = vector.broadcast %cst : f32 to vector<1x8xf32>
    %3 = arith.subf %1, %2 : vector<1x8xf32>
    %cst_2 = arith.constant 1.000000e+09 : f32
    %4 = vector.broadcast %cst_2 : f32 to vector<1x8xf32>
    %5 = arith.mulf %3, %4 : vector<1x8xf32>
    %c0_3 = arith.constant 0 : index
    %c0_4 = arith.constant 0 : index
    %6 = vector.load %arg1[%c0_3, %c0_4] : memref<8x32xf32, #tpu.memory_space<vmem>>, vector<8x32xf32>
    %c0_5 = arith.constant 0 : index
    %c0_6 = arith.constant 0 : index
    %7 = vector.load %arg8[%c0_5, %c0_6] : memref<32x128xf32, #tpu.memory_space<vmem>>, vector<1x32xf32>
    %c1 = arith.constant 1 : index
    %c0_7 = arith.constant 0 : index
    %8 = vector.load %arg8[%c1, %c0_7] : memref<32x128xf32, #tpu.memory_space<vmem>>, vector<1x32xf32>
    %cst_8 = arith.constant dense<0.000000e+00> : vector<8xf32>
    %9 = vector.multi_reduction <add>, %6, %cst_8 [1] : vector<8x32xf32> to vector<8xf32>
    %10 = vector.shape_cast %9 : vector<8xf32> to vector<8x1xf32>
    %cst_9 = arith.constant 3.200000e+01 : f32
    %11 = vector.broadcast %cst_9 : f32 to vector<8x1xf32>
    %12 = arith.divf %10, %11 : vector<8x1xf32>
    %13 = vector.broadcast %12 : vector<8x1xf32> to vector<8x32xf32>
    %14 = arith.subf %6, %13 : vector<8x32xf32>
    %15 = arith.mulf %14, %14 : vector<8x32xf32>
    %cst_10 = arith.constant dense<0.000000e+00> : vector<8xf32>
    %16 = vector.multi_reduction <add>, %15, %cst_10 [1] : vector<8x32xf32> to vector<8xf32>
    %17 = vector.shape_cast %16 : vector<8xf32> to vector<8x1xf32>
    %cst_11 = arith.constant 3.200000e+01 : f32
    %18 = vector.broadcast %cst_11 : f32 to vector<8x1xf32>
    %19 = arith.divf %17, %18 : vector<8x1xf32>
    %cst_12 = arith.constant 9.99999996E-13 : f32
    %20 = vector.broadcast %cst_12 : f32 to vector<8x1xf32>
    %21 = arith.addf %19, %20 : vector<8x1xf32>
    %22 = math.rsqrt %21 : vector<8x1xf32>
    %23 = vector.broadcast %22 : vector<8x1xf32> to vector<8x32xf32>
    %24 = arith.mulf %14, %23 : vector<8x32xf32>
    %25 = vector.broadcast %7 : vector<1x32xf32> to vector<8x32xf32>
    %26 = arith.mulf %24, %25 : vector<8x32xf32>
    %27 = vector.broadcast %8 : vector<1x32xf32> to vector<8x32xf32>
    %28 = arith.addf %26, %27 : vector<8x32xf32>
    %cst_13 = arith.constant 0.000000e+00 : f32
    %29 = vector.broadcast %cst_13 : f32 to vector<8x32xf32>
    %c0_14 = arith.constant 0 : index
    %c0_15 = arith.constant 0 : index
    %c0_16 = arith.constant 0 : index
    %30 = vector.load %arg4[%c0_14, %c0_15, %c0_16] : memref<12x32x16xf32, #tpu.memory_space<vmem>>, vector<1x32x16xf32>
    %31 = vector.shape_cast %30 : vector<1x32x16xf32> to vector<32x16xf32>
    %cst_17 = arith.constant dense<0.000000e+00> : vector<8x16xf32>
    %32 = tpu.matmul %28, %31, %cst_17 {dimension_numbers = #tpu.dot_dimension_numbers<[1], [0], [0], [1], [0, 0, 1, 1], [], []>} : vector<8x32xf32>, vector<32x16xf32>, vector<8x16xf32> -> vector<8x16xf32>
    %c2 = arith.constant 2 : index
    %c0_18 = arith.constant 0 : index
    %33 = vector.load %arg8[%c2, %c0_18] : memref<32x128xf32, #tpu.memory_space<vmem>>, vector<1x16xf32>
    %34 = vector.broadcast %33 : vector<1x16xf32> to vector<8x16xf32>
    %35 = arith.addf %32, %34 : vector<8x16xf32>
    %c1_19 = arith.constant 1 : index
    %c0_20 = arith.constant 0 : index
    %c0_21 = arith.constant 0 : index
    %36 = vector.load %arg4[%c1_19, %c0_20, %c0_21] : memref<12x32x16xf32, #tpu.memory_space<vmem>>, vector<1x32x16xf32>
    %37 = vector.shape_cast %36 : vector<1x32x16xf32> to vector<32x16xf32>
    %cst_22 = arith.constant dense<0.000000e+00> : vector<8x16xf32>
    %38 = tpu.matmul %28, %37, %cst_22 {dimension_numbers = #tpu.dot_dimension_numbers<[1], [0], [0], [1], [0, 0, 1, 1], [], []>} : vector<8x32xf32>, vector<32x16xf32>, vector<8x16xf32> -> vector<8x16xf32>
    %c3 = arith.constant 3 : index
    %c0_23 = arith.constant 0 : index
    %39 = vector.load %arg8[%c3, %c0_23] : memref<32x128xf32, #tpu.memory_space<vmem>>, vector<1x16xf32>
    %40 = vector.broadcast %39 : vector<1x16xf32> to vector<8x16xf32>
    %41 = arith.addf %38, %40 : vector<8x16xf32>
    %c2_24 = arith.constant 2 : index
    %c0_25 = arith.constant 0 : index
    %c0_26 = arith.constant 0 : index
    %42 = vector.load %arg4[%c2_24, %c0_25, %c0_26] : memref<12x32x16xf32, #tpu.memory_space<vmem>>, vector<1x32x16xf32>
    %43 = vector.shape_cast %42 : vector<1x32x16xf32> to vector<32x16xf32>
    %cst_27 = arith.constant dense<0.000000e+00> : vector<8x16xf32>
    %44 = tpu.matmul %28, %43, %cst_27 {dimension_numbers = #tpu.dot_dimension_numbers<[1], [0], [0], [1], [0, 0, 1, 1], [], []>} : vector<8x32xf32>, vector<32x16xf32>, vector<8x16xf32> -> vector<8x16xf32>
    %c4 = arith.constant 4 : index
    %c0_28 = arith.constant 0 : index
    %45 = vector.load %arg8[%c4, %c0_28] : memref<32x128xf32, #tpu.memory_space<vmem>>, vector<1x16xf32>
    %46 = vector.broadcast %45 : vector<1x16xf32> to vector<8x16xf32>
    %47 = arith.addf %44, %46 : vector<8x16xf32>
    %cst_29 = arith.constant dense<0.000000e+00> : vector<8x8xf32>
    %48 = tpu.matmul %35, %41, %cst_29 {dimension_numbers = #tpu.dot_dimension_numbers<[1], [1], [0], [0], [0, 0, 1, 0], [], []>} : vector<8x16xf32>, vector<8x16xf32>, vector<8x8xf32> -> vector<8x8xf32>
    %cst_30 = arith.constant 2.500000e-01 : f32
    %49 = vector.broadcast %cst_30 : f32 to vector<8x8xf32>
    %50 = arith.mulf %48, %49 : vector<8x8xf32>
    %51 = vector.broadcast %5 : vector<1x8xf32> to vector<8x8xf32>
    %52 = arith.addf %50, %51 : vector<8x8xf32>
    %cst_31 = arith.constant dense<0xFF800000> : vector<8xf32>
    %53 = vector.multi_reduction <maximumf>, %52, %cst_31 [1] : vector<8x8xf32> to vector<8xf32>
    %54 = vector.shape_cast %53 : vector<8xf32> to vector<8x1xf32>
    %55 = vector.broadcast %54 : vector<8x1xf32> to vector<8x8xf32>
    %56 = arith.subf %52, %55 : vector<8x8xf32>
    %57 = math.exp %56 : vector<8x8xf32>
    %cst_32 = arith.constant dense<0.000000e+00> : vector<8xf32>
    %58 = vector.multi_reduction <add>, %57, %cst_32 [1] : vector<8x8xf32> to vector<8xf32>
    %59 = vector.shape_cast %58 : vector<8xf32> to vector<8x1xf32>
    %60 = vector.broadcast %59 : vector<8x1xf32> to vector<8x8xf32>
    %61 = arith.divf %57, %60 : vector<8x8xf32>
    %cst_33 = arith.constant dense<0.000000e+00> : vector<8x16xf32>
    %62 = tpu.matmul %61, %47, %cst_33 {dimension_numbers = #tpu.dot_dimension_numbers<[1], [0], [0], [1], [0, 0, 1, 1], [], []>} : vector<8x8xf32>, vector<8x16xf32>, vector<8x16xf32> -> vector<8x16xf32>
    %c0_34 = arith.constant 0 : index
    %c0_35 = arith.constant 0 : index
    %c0_36 = arith.constant 0 : index
    %63 = vector.load %arg5[%c0_34, %c0_35, %c0_36] : memref<4x16x32xf32, #tpu.memory_space<vmem>>, vector<1x16x32xf32>
    %64 = vector.shape_cast %63 : vector<1x16x32xf32> to vector<16x32xf32>
    %cst_37 = arith.constant dense<0.000000e+00> : vector<8x32xf32>
    %65 = tpu.matmul %62, %64, %cst_37 {dimension_numbers = #tpu.dot_dimension_numbers<[1], [0], [0], [1], [0, 0, 1, 1], [], []>} : vector<8x16xf32>, vector<16x32xf32>, vector<8x32xf32> -> vector<8x32xf32>
    %66 = arith.addf %29, %65 : vector<8x32xf32>
    %c3_38 = arith.constant 3 : index
    %c0_39 = arith.constant 0 : index
    %c0_40 = arith.constant 0 : index
    %67 = vector.load %arg4[%c3_38, %c0_39, %c0_40] : memref<12x32x16xf32, #tpu.memory_space<vmem>>, vector<1x32x16xf32>
    %68 = vector.shape_cast %67 : vector<1x32x16xf32> to vector<32x16xf32>
    %cst_41 = arith.constant dense<0.000000e+00> : vector<8x16xf32>
    %69 = tpu.matmul %28, %68, %cst_41 {dimension_numbers = #tpu.dot_dimension_numbers<[1], [0], [0], [1], [0, 0, 1, 1], [], []>} : vector<8x32xf32>, vector<32x16xf32>, vector<8x16xf32> -> vector<8x16xf32>
    %c5 = arith.constant 5 : index
    %c0_42 = arith.constant 0 : index
    %70 = vector.load %arg8[%c5, %c0_42] : memref<32x128xf32, #tpu.memory_space<vmem>>, vector<1x16xf32>
    %71 = vector.broadcast %70 : vector<1x16xf32> to vector<8x16xf32>
    %72 = arith.addf %69, %71 : vector<8x16xf32>
    %c4_43 = arith.constant 4 : index
    %c0_44 = arith.constant 0 : index
    %c0_45 = arith.constant 0 : index
    %73 = vector.load %arg4[%c4_43, %c0_44, %c0_45] : memref<12x32x16xf32, #tpu.memory_space<vmem>>, vector<1x32x16xf32>
    %74 = vector.shape_cast %73 : vector<1x32x16xf32> to vector<32x16xf32>
    %cst_46 = arith.constant dense<0.000000e+00> : vector<8x16xf32>
    %75 = tpu.matmul %28, %74, %cst_46 {dimension_numbers = #tpu.dot_dimension_numbers<[1], [0], [0], [1], [0, 0, 1, 1], [], []>} : vector<8x32xf32>, vector<32x16xf32>, vector<8x16xf32> -> vector<8x16xf32>
    %c6 = arith.constant 6 : index
    %c0_47 = arith.constant 0 : index
    %76 = vector.load %arg8[%c6, %c0_47] : memref<32x128xf32, #tpu.memory_space<vmem>>, vector<1x16xf32>
    %77 = vector.broadcast %76 : vector<1x16xf32> to vector<8x16xf32>
    %78 = arith.addf %75, %77 : vector<8x16xf32>
    %c5_48 = arith.constant 5 : index
    %c0_49 = arith.constant 0 : index
    %c0_50 = arith.constant 0 : index
    %79 = vector.load %arg4[%c5_48, %c0_49, %c0_50] : memref<12x32x16xf32, #tpu.memory_space<vmem>>, vector<1x32x16xf32>
    %80 = vector.shape_cast %79 : vector<1x32x16xf32> to vector<32x16xf32>
    %cst_51 = arith.constant dense<0.000000e+00> : vector<8x16xf32>
    %81 = tpu.matmul %28, %80, %cst_51 {dimension_numbers = #tpu.dot_dimension_numbers<[1], [0], [0], [1], [0, 0, 1, 1], [], []>} : vector<8x32xf32>, vector<32x16xf32>, vector<8x16xf32> -> vector<8x16xf32>
    %c7 = arith.constant 7 : index
    %c0_52 = arith.constant 0 : index
    %82 = vector.load %arg8[%c7, %c0_52] : memref<32x128xf32, #tpu.memory_space<vmem>>, vector<1x16xf32>
    %83 = vector.broadcast %82 : vector<1x16xf32> to vector<8x16xf32>
    %84 = arith.addf %81, %83 : vector<8x16xf32>
    %cst_53 = arith.constant dense<0.000000e+00> : vector<8x8xf32>
    %85 = tpu.matmul %72, %78, %cst_53 {dimension_numbers = #tpu.dot_dimension_numbers<[1], [1], [0], [0], [0, 0, 1, 0], [], []>} : vector<8x16xf32>, vector<8x16xf32>, vector<8x8xf32> -> vector<8x8xf32>
    %cst_54 = arith.constant 2.500000e-01 : f32
    %86 = vector.broadcast %cst_54 : f32 to vector<8x8xf32>
    %87 = arith.mulf %85, %86 : vector<8x8xf32>
    %88 = vector.broadcast %5 : vector<1x8xf32> to vector<8x8xf32>
    %89 = arith.addf %87, %88 : vector<8x8xf32>
    %cst_55 = arith.constant dense<0xFF800000> : vector<8xf32>
    %90 = vector.multi_reduction <maximumf>, %89, %cst_55 [1] : vector<8x8xf32> to vector<8xf32>
    %91 = vector.shape_cast %90 : vector<8xf32> to vector<8x1xf32>
    %92 = vector.broadcast %91 : vector<8x1xf32> to vector<8x8xf32>
    %93 = arith.subf %89, %92 : vector<8x8xf32>
    %94 = math.exp %93 : vector<8x8xf32>
    %cst_56 = arith.constant dense<0.000000e+00> : vector<8xf32>
    %95 = vector.multi_reduction <add>, %94, %cst_56 [1] : vector<8x8xf32> to vector<8xf32>
    %96 = vector.shape_cast %95 : vector<8xf32> to vector<8x1xf32>
    %97 = vector.broadcast %96 : vector<8x1xf32> to vector<8x8xf32>
    %98 = arith.divf %94, %97 : vector<8x8xf32>
    %cst_57 = arith.constant dense<0.000000e+00> : vector<8x16xf32>
    %99 = tpu.matmul %98, %84, %cst_57 {dimension_numbers = #tpu.dot_dimension_numbers<[1], [0], [0], [1], [0, 0, 1, 1], [], []>} : vector<8x8xf32>, vector<8x16xf32>, vector<8x16xf32> -> vector<8x16xf32>
    %c1_58 = arith.constant 1 : index
    %c0_59 = arith.constant 0 : index
    %c0_60 = arith.constant 0 : index
    %100 = vector.load %arg5[%c1_58, %c0_59, %c0_60] : memref<4x16x32xf32, #tpu.memory_space<vmem>>, vector<1x16x32xf32>
    %101 = vector.shape_cast %100 : vector<1x16x32xf32> to vector<16x32xf32>
    %cst_61 = arith.constant dense<0.000000e+00> : vector<8x32xf32>
    %102 = tpu.matmul %99, %101, %cst_61 {dimension_numbers = #tpu.dot_dimension_numbers<[1], [0], [0], [1], [0, 0, 1, 1], [], []>} : vector<8x16xf32>, vector<16x32xf32>, vector<8x32xf32> -> vector<8x32xf32>
    %103 = arith.addf %66, %102 : vector<8x32xf32>
    %c8 = arith.constant 8 : index
    %c0_62 = arith.constant 0 : index
    %104 = vector.load %arg8[%c8, %c0_62] : memref<32x128xf32, #tpu.memory_space<vmem>>, vector<1x32xf32>
    %105 = vector.broadcast %104 : vector<1x32xf32> to vector<8x32xf32>
    %106 = arith.addf %103, %105 : vector<8x32xf32>
    %107 = arith.addf %106, %28 : vector<8x32xf32>
    %c9 = arith.constant 9 : index
    %c0_63 = arith.constant 0 : index
    %108 = vector.load %arg8[%c9, %c0_63] : memref<32x128xf32, #tpu.memory_space<vmem>>, vector<1x32xf32>
    %c10 = arith.constant 10 : index
    %c0_64 = arith.constant 0 : index
    %109 = vector.load %arg8[%c10, %c0_64] : memref<32x128xf32, #tpu.memory_space<vmem>>, vector<1x32xf32>
    %cst_65 = arith.constant dense<0.000000e+00> : vector<8xf32>
    %110 = vector.multi_reduction <add>, %107, %cst_65 [1] : vector<8x32xf32> to vector<8xf32>
    %111 = vector.shape_cast %110 : vector<8xf32> to vector<8x1xf32>
    %cst_66 = arith.constant 3.200000e+01 : f32
    %112 = vector.broadcast %cst_66 : f32 to vector<8x1xf32>
    %113 = arith.divf %111, %112 : vector<8x1xf32>
    %114 = vector.broadcast %113 : vector<8x1xf32> to vector<8x32xf32>
    %115 = arith.subf %107, %114 : vector<8x32xf32>
    %116 = arith.mulf %115, %115 : vector<8x32xf32>
    %cst_67 = arith.constant dense<0.000000e+00> : vector<8xf32>
    %117 = vector.multi_reduction <add>, %116, %cst_67 [1] : vector<8x32xf32> to vector<8xf32>
    %118 = vector.shape_cast %117 : vector<8xf32> to vector<8x1xf32>
    %cst_68 = arith.constant 3.200000e+01 : f32
    %119 = vector.broadcast %cst_68 : f32 to vector<8x1xf32>
    %120 = arith.divf %118, %119 : vector<8x1xf32>
    %cst_69 = arith.constant 9.99999996E-13 : f32
    %121 = vector.broadcast %cst_69 : f32 to vector<8x1xf32>
    %122 = arith.addf %120, %121 : vector<8x1xf32>
    %123 = math.rsqrt %122 : vector<8x1xf32>
    %124 = vector.broadcast %123 : vector<8x1xf32> to vector<8x32xf32>
    %125 = arith.mulf %115, %124 : vector<8x32xf32>
    %126 = vector.broadcast %108 : vector<1x32xf32> to vector<8x32xf32>
    %127 = arith.mulf %125, %126 : vector<8x32xf32>
    %128 = vector.broadcast %109 : vector<1x32xf32> to vector<8x32xf32>
    %129 = arith.addf %127, %128 : vector<8x32xf32>
    %c0_70 = arith.constant 0 : index
    %c0_71 = arith.constant 0 : index
    %c0_72 = arith.constant 0 : index
    %130 = vector.load %arg6[%c0_70, %c0_71, %c0_72] : memref<2x96x64xf32, #tpu.memory_space<vmem>>, vector<1x32x64xf32>
    %131 = vector.shape_cast %130 : vector<1x32x64xf32> to vector<32x64xf32>
    %cst_73 = arith.constant dense<0.000000e+00> : vector<8x64xf32>
    %132 = tpu.matmul %129, %131, %cst_73 {dimension_numbers = #tpu.dot_dimension_numbers<[1], [0], [0], [1], [0, 0, 1, 1], [], []>} : vector<8x32xf32>, vector<32x64xf32>, vector<8x64xf32> -> vector<8x64xf32>
    %c11 = arith.constant 11 : index
    %c0_74 = arith.constant 0 : index
    %133 = vector.load %arg8[%c11, %c0_74] : memref<32x128xf32, #tpu.memory_space<vmem>>, vector<1x64xf32>
    %134 = vector.broadcast %133 : vector<1x64xf32> to vector<8x64xf32>
    %135 = arith.addf %132, %134 : vector<8x64xf32>
    %cst_75 = arith.constant 5.000000e-01 : f32
    %136 = vector.broadcast %cst_75 : f32 to vector<8x64xf32>
    %137 = arith.mulf %136, %135 : vector<8x64xf32>
    %cst_76 = arith.constant 0.707106769 : f32
    %138 = vector.broadcast %cst_76 : f32 to vector<8x64xf32>
    %139 = arith.mulf %135, %138 : vector<8x64xf32>
    %140 = math.erf %139 : vector<8x64xf32>
    %cst_77 = arith.constant 1.000000e+00 : f32
    %141 = vector.broadcast %cst_77 : f32 to vector<8x64xf32>
    %142 = arith.addf %141, %140 : vector<8x64xf32>
    %143 = arith.mulf %137, %142 : vector<8x64xf32>
    %c0_78 = arith.constant 0 : index
    %c32 = arith.constant 32 : index
    %c0_79 = arith.constant 0 : index
    %144 = vector.load %arg6[%c0_78, %c32, %c0_79] : memref<2x96x64xf32, #tpu.memory_space<vmem>>, vector<1x64x32xf32>
    %145 = vector.shape_cast %144 : vector<1x64x32xf32> to vector<64x32xf32>
    %cst_80 = arith.constant dense<0.000000e+00> : vector<8x32xf32>
    %146 = tpu.matmul %143, %145, %cst_80 {dimension_numbers = #tpu.dot_dimension_numbers<[1], [0], [0], [1], [0, 0, 1, 1], [], []>} : vector<8x64xf32>, vector<64x32xf32>, vector<8x32xf32> -> vector<8x32xf32>
    %c12 = arith.constant 12 : index
    %c0_81 = arith.constant 0 : index
    %147 = vector.load %arg8[%c12, %c0_81] : memref<32x128xf32, #tpu.memory_space<vmem>>, vector<1x32xf32>
    %148 = vector.broadcast %147 : vector<1x32xf32> to vector<8x32xf32>
    %149 = arith.addf %146, %148 : vector<8x32xf32>
    %150 = arith.addf %149, %129 : vector<8x32xf32>
    %c13 = arith.constant 13 : index
    %c0_82 = arith.constant 0 : index
    %151 = vector.load %arg8[%c13, %c0_82] : memref<32x128xf32, #tpu.memory_space<vmem>>, vector<1x32xf32>
    %c14 = arith.constant 14 : index
    %c0_83 = arith.constant 0 : index
    %152 = vector.load %arg8[%c14, %c0_83] : memref<32x128xf32, #tpu.memory_space<vmem>>, vector<1x32xf32>
    %cst_84 = arith.constant dense<0.000000e+00> : vector<8xf32>
    %153 = vector.multi_reduction <add>, %150, %cst_84 [1] : vector<8x32xf32> to vector<8xf32>
    %154 = vector.shape_cast %153 : vector<8xf32> to vector<8x1xf32>
    %cst_85 = arith.constant 3.200000e+01 : f32
    %155 = vector.broadcast %cst_85 : f32 to vector<8x1xf32>
    %156 = arith.divf %154, %155 : vector<8x1xf32>
    %157 = vector.broadcast %156 : vector<8x1xf32> to vector<8x32xf32>
    %158 = arith.subf %150, %157 : vector<8x32xf32>
    %159 = arith.mulf %158, %158 : vector<8x32xf32>
    %cst_86 = arith.constant dense<0.000000e+00> : vector<8xf32>
    %160 = vector.multi_reduction <add>, %159, %cst_86 [1] : vector<8x32xf32> to vector<8xf32>
    %161 = vector.shape_cast %160 : vector<8xf32> to vector<8x1xf32>
    %cst_87 = arith.constant 3.200000e+01 : f32
    %162 = vector.broadcast %cst_87 : f32 to vector<8x1xf32>
    %163 = arith.divf %161, %162 : vector<8x1xf32>
    %cst_88 = arith.constant 9.99999996E-13 : f32
    %164 = vector.broadcast %cst_88 : f32 to vector<8x1xf32>
    %165 = arith.addf %163, %164 : vector<8x1xf32>
    %166 = math.rsqrt %165 : vector<8x1xf32>
    %167 = vector.broadcast %166 : vector<8x1xf32> to vector<8x32xf32>
    %168 = arith.mulf %158, %167 : vector<8x32xf32>
    %169 = vector.broadcast %151 : vector<1x32xf32> to vector<8x32xf32>
    %170 = arith.mulf %168, %169 : vector<8x32xf32>
    %171 = vector.broadcast %152 : vector<1x32xf32> to vector<8x32xf32>
    %172 = arith.addf %170, %171 : vector<8x32xf32>
    %cst_89 = arith.constant 0.000000e+00 : f32
    %173 = vector.broadcast %cst_89 : f32 to vector<8x32xf32>
    %c6_90 = arith.constant 6 : index
    %c0_91 = arith.constant 0 : index
    %c0_92 = arith.constant 0 : index
    %174 = vector.load %arg4[%c6_90, %c0_91, %c0_92] : memref<12x32x16xf32, #tpu.memory_space<vmem>>, vector<1x32x16xf32>
    %175 = vector.shape_cast %174 : vector<1x32x16xf32> to vector<32x16xf32>
    %cst_93 = arith.constant dense<0.000000e+00> : vector<8x16xf32>
    %176 = tpu.matmul %172, %175, %cst_93 {dimension_numbers = #tpu.dot_dimension_numbers<[1], [0], [0], [1], [0, 0, 1, 1], [], []>} : vector<8x32xf32>, vector<32x16xf32>, vector<8x16xf32> -> vector<8x16xf32>
    %c15 = arith.constant 15 : index
    %c0_94 = arith.constant 0 : index
    %177 = vector.load %arg8[%c15, %c0_94] : memref<32x128xf32, #tpu.memory_space<vmem>>, vector<1x16xf32>
    %178 = vector.broadcast %177 : vector<1x16xf32> to vector<8x16xf32>
    %179 = arith.addf %176, %178 : vector<8x16xf32>
    %c7_95 = arith.constant 7 : index
    %c0_96 = arith.constant 0 : index
    %c0_97 = arith.constant 0 : index
    %180 = vector.load %arg4[%c7_95, %c0_96, %c0_97] : memref<12x32x16xf32, #tpu.memory_space<vmem>>, vector<1x32x16xf32>
    %181 = vector.shape_cast %180 : vector<1x32x16xf32> to vector<32x16xf32>
    %cst_98 = arith.constant dense<0.000000e+00> : vector<8x16xf32>
    %182 = tpu.matmul %172, %181, %cst_98 {dimension_numbers = #tpu.dot_dimension_numbers<[1], [0], [0], [1], [0, 0, 1, 1], [], []>} : vector<8x32xf32>, vector<32x16xf32>, vector<8x16xf32> -> vector<8x16xf32>
    %c16 = arith.constant 16 : index
    %c0_99 = arith.constant 0 : index
    %183 = vector.load %arg8[%c16, %c0_99] : memref<32x128xf32, #tpu.memory_space<vmem>>, vector<1x16xf32>
    %184 = vector.broadcast %183 : vector<1x16xf32> to vector<8x16xf32>
    %185 = arith.addf %182, %184 : vector<8x16xf32>
    %c8_100 = arith.constant 8 : index
    %c0_101 = arith.constant 0 : index
    %c0_102 = arith.constant 0 : index
    %186 = vector.load %arg4[%c8_100, %c0_101, %c0_102] : memref<12x32x16xf32, #tpu.memory_space<vmem>>, vector<1x32x16xf32>
    %187 = vector.shape_cast %186 : vector<1x32x16xf32> to vector<32x16xf32>
    %cst_103 = arith.constant dense<0.000000e+00> : vector<8x16xf32>
    %188 = tpu.matmul %172, %187, %cst_103 {dimension_numbers = #tpu.dot_dimension_numbers<[1], [0], [0], [1], [0, 0, 1, 1], [], []>} : vector<8x32xf32>, vector<32x16xf32>, vector<8x16xf32> -> vector<8x16xf32>
    %c17 = arith.constant 17 : index
    %c0_104 = arith.constant 0 : index
    %189 = vector.load %arg8[%c17, %c0_104] : memref<32x128xf32, #tpu.memory_space<vmem>>, vector<1x16xf32>
    %190 = vector.broadcast %189 : vector<1x16xf32> to vector<8x16xf32>
    %191 = arith.addf %188, %190 : vector<8x16xf32>
    %cst_105 = arith.constant dense<0.000000e+00> : vector<8x8xf32>
    %192 = tpu.matmul %179, %185, %cst_105 {dimension_numbers = #tpu.dot_dimension_numbers<[1], [1], [0], [0], [0, 0, 1, 0], [], []>} : vector<8x16xf32>, vector<8x16xf32>, vector<8x8xf32> -> vector<8x8xf32>
    %cst_106 = arith.constant 2.500000e-01 : f32
    %193 = vector.broadcast %cst_106 : f32 to vector<8x8xf32>
    %194 = arith.mulf %192, %193 : vector<8x8xf32>
    %195 = vector.broadcast %5 : vector<1x8xf32> to vector<8x8xf32>
    %196 = arith.addf %194, %195 : vector<8x8xf32>
    %cst_107 = arith.constant dense<0xFF800000> : vector<8xf32>
    %197 = vector.multi_reduction <maximumf>, %196, %cst_107 [1] : vector<8x8xf32> to vector<8xf32>
    %198 = vector.shape_cast %197 : vector<8xf32> to vector<8x1xf32>
    %199 = vector.broadcast %198 : vector<8x1xf32> to vector<8x8xf32>
    %200 = arith.subf %196, %199 : vector<8x8xf32>
    %201 = math.exp %200 : vector<8x8xf32>
    %cst_108 = arith.constant dense<0.000000e+00> : vector<8xf32>
    %202 = vector.multi_reduction <add>, %201, %cst_108 [1] : vector<8x8xf32> to vector<8xf32>
    %203 = vector.shape_cast %202 : vector<8xf32> to vector<8x1xf32>
    %204 = vector.broadcast %203 : vector<8x1xf32> to vector<8x8xf32>
    %205 = arith.divf %201, %204 : vector<8x8xf32>
    %cst_109 = arith.constant dense<0.000000e+00> : vector<8x16xf32>
    %206 = tpu.matmul %205, %191, %cst_109 {dimension_numbers = #tpu.dot_dimension_numbers<[1], [0], [0], [1], [0, 0, 1, 1], [], []>} : vector<8x8xf32>, vector<8x16xf32>, vector<8x16xf32> -> vector<8x16xf32>
    %c2_110 = arith.constant 2 : index
    %c0_111 = arith.constant 0 : index
    %c0_112 = arith.constant 0 : index
    %207 = vector.load %arg5[%c2_110, %c0_111, %c0_112] : memref<4x16x32xf32, #tpu.memory_space<vmem>>, vector<1x16x32xf32>
    %208 = vector.shape_cast %207 : vector<1x16x32xf32> to vector<16x32xf32>
    %cst_113 = arith.constant dense<0.000000e+00> : vector<8x32xf32>
    %209 = tpu.matmul %206, %208, %cst_113 {dimension_numbers = #tpu.dot_dimension_numbers<[1], [0], [0], [1], [0, 0, 1, 1], [], []>} : vector<8x16xf32>, vector<16x32xf32>, vector<8x32xf32> -> vector<8x32xf32>
    %210 = arith.addf %173, %209 : vector<8x32xf32>
    %c9_114 = arith.constant 9 : index
    %c0_115 = arith.constant 0 : index
    %c0_116 = arith.constant 0 : index
    %211 = vector.load %arg4[%c9_114, %c0_115, %c0_116] : memref<12x32x16xf32, #tpu.memory_space<vmem>>, vector<1x32x16xf32>
    %212 = vector.shape_cast %211 : vector<1x32x16xf32> to vector<32x16xf32>
    %cst_117 = arith.constant dense<0.000000e+00> : vector<8x16xf32>
    %213 = tpu.matmul %172, %212, %cst_117 {dimension_numbers = #tpu.dot_dimension_numbers<[1], [0], [0], [1], [0, 0, 1, 1], [], []>} : vector<8x32xf32>, vector<32x16xf32>, vector<8x16xf32> -> vector<8x16xf32>
    %c18 = arith.constant 18 : index
    %c0_118 = arith.constant 0 : index
    %214 = vector.load %arg8[%c18, %c0_118] : memref<32x128xf32, #tpu.memory_space<vmem>>, vector<1x16xf32>
    %215 = vector.broadcast %214 : vector<1x16xf32> to vector<8x16xf32>
    %216 = arith.addf %213, %215 : vector<8x16xf32>
    %c10_119 = arith.constant 10 : index
    %c0_120 = arith.constant 0 : index
    %c0_121 = arith.constant 0 : index
    %217 = vector.load %arg4[%c10_119, %c0_120, %c0_121] : memref<12x32x16xf32, #tpu.memory_space<vmem>>, vector<1x32x16xf32>
    %218 = vector.shape_cast %217 : vector<1x32x16xf32> to vector<32x16xf32>
    %cst_122 = arith.constant dense<0.000000e+00> : vector<8x16xf32>
    %219 = tpu.matmul %172, %218, %cst_122 {dimension_numbers = #tpu.dot_dimension_numbers<[1], [0], [0], [1], [0, 0, 1, 1], [], []>} : vector<8x32xf32>, vector<32x16xf32>, vector<8x16xf32> -> vector<8x16xf32>
    %c19 = arith.constant 19 : index
    %c0_123 = arith.constant 0 : index
    %220 = vector.load %arg8[%c19, %c0_123] : memref<32x128xf32, #tpu.memory_space<vmem>>, vector<1x16xf32>
    %221 = vector.broadcast %220 : vector<1x16xf32> to vector<8x16xf32>
    %222 = arith.addf %219, %221 : vector<8x16xf32>
    %c11_124 = arith.constant 11 : index
    %c0_125 = arith.constant 0 : index
    %c0_126 = arith.constant 0 : index
    %223 = vector.load %arg4[%c11_124, %c0_125, %c0_126] : memref<12x32x16xf32, #tpu.memory_space<vmem>>, vector<1x32x16xf32>
    %224 = vector.shape_cast %223 : vector<1x32x16xf32> to vector<32x16xf32>
    %cst_127 = arith.constant dense<0.000000e+00> : vector<8x16xf32>
    %225 = tpu.matmul %172, %224, %cst_127 {dimension_numbers = #tpu.dot_dimension_numbers<[1], [0], [0], [1], [0, 0, 1, 1], [], []>} : vector<8x32xf32>, vector<32x16xf32>, vector<8x16xf32> -> vector<8x16xf32>
    %c20 = arith.constant 20 : index
    %c0_128 = arith.constant 0 : index
    %226 = vector.load %arg8[%c20, %c0_128] : memref<32x128xf32, #tpu.memory_space<vmem>>, vector<1x16xf32>
    %227 = vector.broadcast %226 : vector<1x16xf32> to vector<8x16xf32>
    %228 = arith.addf %225, %227 : vector<8x16xf32>
    %cst_129 = arith.constant dense<0.000000e+00> : vector<8x8xf32>
    %229 = tpu.matmul %216, %222, %cst_129 {dimension_numbers = #tpu.dot_dimension_numbers<[1], [1], [0], [0], [0, 0, 1, 0], [], []>} : vector<8x16xf32>, vector<8x16xf32>, vector<8x8xf32> -> vector<8x8xf32>
    %cst_130 = arith.constant 2.500000e-01 : f32
    %230 = vector.broadcast %cst_130 : f32 to vector<8x8xf32>
    %231 = arith.mulf %229, %230 : vector<8x8xf32>
    %232 = vector.broadcast %5 : vector<1x8xf32> to vector<8x8xf32>
    %233 = arith.addf %231, %232 : vector<8x8xf32>
    %cst_131 = arith.constant dense<0xFF800000> : vector<8xf32>
    %234 = vector.multi_reduction <maximumf>, %233, %cst_131 [1] : vector<8x8xf32> to vector<8xf32>
    %235 = vector.shape_cast %234 : vector<8xf32> to vector<8x1xf32>
    %236 = vector.broadcast %235 : vector<8x1xf32> to vector<8x8xf32>
    %237 = arith.subf %233, %236 : vector<8x8xf32>
    %238 = math.exp %237 : vector<8x8xf32>
    %cst_132 = arith.constant dense<0.000000e+00> : vector<8xf32>
    %239 = vector.multi_reduction <add>, %238, %cst_132 [1] : vector<8x8xf32> to vector<8xf32>
    %240 = vector.shape_cast %239 : vector<8xf32> to vector<8x1xf32>
    %241 = vector.broadcast %240 : vector<8x1xf32> to vector<8x8xf32>
    %242 = arith.divf %238, %241 : vector<8x8xf32>
    %cst_133 = arith.constant dense<0.000000e+00> : vector<8x16xf32>
    %243 = tpu.matmul %242, %228, %cst_133 {dimension_numbers = #tpu.dot_dimension_numbers<[1], [0], [0], [1], [0, 0, 1, 1], [], []>} : vector<8x8xf32>, vector<8x16xf32>, vector<8x16xf32> -> vector<8x16xf32>
    %c3_134 = arith.constant 3 : index
    %c0_135 = arith.constant 0 : index
    %c0_136 = arith.constant 0 : index
    %244 = vector.load %arg5[%c3_134, %c0_135, %c0_136] : memref<4x16x32xf32, #tpu.memory_space<vmem>>, vector<1x16x32xf32>
    %245 = vector.shape_cast %244 : vector<1x16x32xf32> to vector<16x32xf32>
    %cst_137 = arith.constant dense<0.000000e+00> : vector<8x32xf32>
    %246 = tpu.matmul %243, %245, %cst_137 {dimension_numbers = #tpu.dot_dimension_numbers<[1], [0], [0], [1], [0, 0, 1, 1], [], []>} : vector<8x16xf32>, vector<16x32xf32>, vector<8x32xf32> -> vector<8x32xf32>
    %247 = arith.addf %210, %246 : vector<8x32xf32>
    %c21 = arith.constant 21 : index
    %c0_138 = arith.constant 0 : index
    %248 = vector.load %arg8[%c21, %c0_138] : memref<32x128xf32, #tpu.memory_space<vmem>>, vector<1x32xf32>
    %249 = vector.broadcast %248 : vector<1x32xf32> to vector<8x32xf32>
    %250 = arith.addf %247, %249 : vector<8x32xf32>
    %251 = arith.addf %250, %172 : vector<8x32xf32>
    %c22 = arith.constant 22 : index
    %c0_139 = arith.constant 0 : index
    %252 = vector.load %arg8[%c22, %c0_139] : memref<32x128xf32, #tpu.memory_space<vmem>>, vector<1x32xf32>
    %c23 = arith.constant 23 : index
    %c0_140 = arith.constant 0 : index
    %253 = vector.load %arg8[%c23, %c0_140] : memref<32x128xf32, #tpu.memory_space<vmem>>, vector<1x32xf32>
    %cst_141 = arith.constant dense<0.000000e+00> : vector<8xf32>
    %254 = vector.multi_reduction <add>, %251, %cst_141 [1] : vector<8x32xf32> to vector<8xf32>
    %255 = vector.shape_cast %254 : vector<8xf32> to vector<8x1xf32>
    %cst_142 = arith.constant 3.200000e+01 : f32
    %256 = vector.broadcast %cst_142 : f32 to vector<8x1xf32>
    %257 = arith.divf %255, %256 : vector<8x1xf32>
    %258 = vector.broadcast %257 : vector<8x1xf32> to vector<8x32xf32>
    %259 = arith.subf %251, %258 : vector<8x32xf32>
    %260 = arith.mulf %259, %259 : vector<8x32xf32>
    %cst_143 = arith.constant dense<0.000000e+00> : vector<8xf32>
    %261 = vector.multi_reduction <add>, %260, %cst_143 [1] : vector<8x32xf32> to vector<8xf32>
    %262 = vector.shape_cast %261 : vector<8xf32> to vector<8x1xf32>
    %cst_144 = arith.constant 3.200000e+01 : f32
    %263 = vector.broadcast %cst_144 : f32 to vector<8x1xf32>
    %264 = arith.divf %262, %263 : vector<8x1xf32>
    %cst_145 = arith.constant 9.99999996E-13 : f32
    %265 = vector.broadcast %cst_145 : f32 to vector<8x1xf32>
    %266 = arith.addf %264, %265 : vector<8x1xf32>
    %267 = math.rsqrt %266 : vector<8x1xf32>
    %268 = vector.broadcast %267 : vector<8x1xf32> to vector<8x32xf32>
    %269 = arith.mulf %259, %268 : vector<8x32xf32>
    %270 = vector.broadcast %252 : vector<1x32xf32> to vector<8x32xf32>
    %271 = arith.mulf %269, %270 : vector<8x32xf32>
    %272 = vector.broadcast %253 : vector<1x32xf32> to vector<8x32xf32>
    %273 = arith.addf %271, %272 : vector<8x32xf32>
    %c1_146 = arith.constant 1 : index
    %c0_147 = arith.constant 0 : index
    %c0_148 = arith.constant 0 : index
    %274 = vector.load %arg6[%c1_146, %c0_147, %c0_148] : memref<2x96x64xf32, #tpu.memory_space<vmem>>, vector<1x32x64xf32>
    %275 = vector.shape_cast %274 : vector<1x32x64xf32> to vector<32x64xf32>
    %cst_149 = arith.constant dense<0.000000e+00> : vector<8x64xf32>
    %276 = tpu.matmul %273, %275, %cst_149 {dimension_numbers = #tpu.dot_dimension_numbers<[1], [0], [0], [1], [0, 0, 1, 1], [], []>} : vector<8x32xf32>, vector<32x64xf32>, vector<8x64xf32> -> vector<8x64xf32>
    %c24 = arith.constant 24 : index
    %c0_150 = arith.constant 0 : index
    %277 = vector.load %arg8[%c24, %c0_150] : memref<32x128xf32, #tpu.memory_space<vmem>>, vector<1x64xf32>
    %278 = vector.broadcast %277 : vector<1x64xf32> to vector<8x64xf32>
    %279 = arith.addf %276, %278 : vector<8x64xf32>
    %cst_151 = arith.constant 5.000000e-01 : f32
    %280 = vector.broadcast %cst_151 : f32 to vector<8x64xf32>
    %281 = arith.mulf %280, %279 : vector<8x64xf32>
    %cst_152 = arith.constant 0.707106769 : f32
    %282 = vector.broadcast %cst_152 : f32 to vector<8x64xf32>
    %283 = arith.mulf %279, %282 : vector<8x64xf32>
    %284 = math.erf %283 : vector<8x64xf32>
    %cst_153 = arith.constant 1.000000e+00 : f32
    %285 = vector.broadcast %cst_153 : f32 to vector<8x64xf32>
    %286 = arith.addf %285, %284 : vector<8x64xf32>
    %287 = arith.mulf %281, %286 : vector<8x64xf32>
    %c1_154 = arith.constant 1 : index
    %c32_155 = arith.constant 32 : index
    %c0_156 = arith.constant 0 : index
    %288 = vector.load %arg6[%c1_154, %c32_155, %c0_156] : memref<2x96x64xf32, #tpu.memory_space<vmem>>, vector<1x64x32xf32>
    %289 = vector.shape_cast %288 : vector<1x64x32xf32> to vector<64x32xf32>
    %cst_157 = arith.constant dense<0.000000e+00> : vector<8x32xf32>
    %290 = tpu.matmul %287, %289, %cst_157 {dimension_numbers = #tpu.dot_dimension_numbers<[1], [0], [0], [1], [0, 0, 1, 1], [], []>} : vector<8x64xf32>, vector<64x32xf32>, vector<8x32xf32> -> vector<8x32xf32>
    %c25 = arith.constant 25 : index
    %c0_158 = arith.constant 0 : index
    %291 = vector.load %arg8[%c25, %c0_158] : memref<32x128xf32, #tpu.memory_space<vmem>>, vector<1x32xf32>
    %292 = vector.broadcast %291 : vector<1x32xf32> to vector<8x32xf32>
    %293 = arith.addf %290, %292 : vector<8x32xf32>
    %294 = arith.addf %293, %273 : vector<8x32xf32>
    %c26 = arith.constant 26 : index
    %c0_159 = arith.constant 0 : index
    %295 = vector.load %arg8[%c26, %c0_159] : memref<32x128xf32, #tpu.memory_space<vmem>>, vector<1x32xf32>
    %c27 = arith.constant 27 : index
    %c0_160 = arith.constant 0 : index
    %296 = vector.load %arg8[%c27, %c0_160] : memref<32x128xf32, #tpu.memory_space<vmem>>, vector<1x32xf32>
    %cst_161 = arith.constant dense<0.000000e+00> : vector<8xf32>
    %297 = vector.multi_reduction <add>, %294, %cst_161 [1] : vector<8x32xf32> to vector<8xf32>
    %298 = vector.shape_cast %297 : vector<8xf32> to vector<8x1xf32>
    %cst_162 = arith.constant 3.200000e+01 : f32
    %299 = vector.broadcast %cst_162 : f32 to vector<8x1xf32>
    %300 = arith.divf %298, %299 : vector<8x1xf32>
    %301 = vector.broadcast %300 : vector<8x1xf32> to vector<8x32xf32>
    %302 = arith.subf %294, %301 : vector<8x32xf32>
    %303 = arith.mulf %302, %302 : vector<8x32xf32>
    %cst_163 = arith.constant dense<0.000000e+00> : vector<8xf32>
    %304 = vector.multi_reduction <add>, %303, %cst_163 [1] : vector<8x32xf32> to vector<8xf32>
    %305 = vector.shape_cast %304 : vector<8xf32> to vector<8x1xf32>
    %cst_164 = arith.constant 3.200000e+01 : f32
    %306 = vector.broadcast %cst_164 : f32 to vector<8x1xf32>
    %307 = arith.divf %305, %306 : vector<8x1xf32>
    %cst_165 = arith.constant 9.99999996E-13 : f32
    %308 = vector.broadcast %cst_165 : f32 to vector<8x1xf32>
    %309 = arith.addf %307, %308 : vector<8x1xf32>
    %310 = math.rsqrt %309 : vector<8x1xf32>
    %311 = vector.broadcast %310 : vector<8x1xf32> to vector<8x32xf32>
    %312 = arith.mulf %302, %311 : vector<8x32xf32>
    %313 = vector.broadcast %295 : vector<1x32xf32> to vector<8x32xf32>
    %314 = arith.mulf %312, %313 : vector<8x32xf32>
    %315 = vector.broadcast %296 : vector<1x32xf32> to vector<8x32xf32>
    %316 = arith.addf %314, %315 : vector<8x32xf32>
    %c0_166 = arith.constant 0 : index
    %c0_167 = arith.constant 0 : index
    %317 = vector.load %arg7[%c0_166, %c0_167] : memref<32x256xf32, #tpu.memory_space<vmem>>, vector<32x256xf32>
    %cst_168 = arith.constant dense<0.000000e+00> : vector<8x256xf32>
    %318 = tpu.matmul %316, %317, %cst_168 {dimension_numbers = #tpu.dot_dimension_numbers<[1], [0], [0], [1], [0, 0, 1, 1], [], []>} : vector<8x32xf32>, vector<32x256xf32>, vector<8x256xf32> -> vector<8x256xf32>
    %319 = tpu.iota {dimensions = array<i32: 0>} : vector<8x8xi32>
    %320 = tpu.iota {dimensions = array<i32: 1>} : vector<8x8xi32>
    %c1_i32 = arith.constant 1 : i32
    %321 = vector.broadcast %c1_i32 : i32 to vector<8x8xi32>
    %322 = arith.addi %320, %321 : vector<8x8xi32>
    %323 = arith.cmpi eq, %319, %322 : vector<8x8xi32>
    %324 = arith.extui %323 : vector<8x8xi1> to vector<8x8xi32>
    %325 = arith.sitofp %324 : vector<8x8xi32> to vector<8x8xf32>
    %326 = vector.extract_strided_slice %318 {offsets = [0, 0], sizes = [8, 128], strides = [1, 1]} : vector<8x256xf32> to vector<8x128xf32>
    %327 = vector.extract_strided_slice %318 {offsets = [0, 128], sizes = [8, 128], strides = [1, 1]} : vector<8x256xf32> to vector<8x128xf32>
    %cst_169 = arith.constant dense<0.000000e+00> : vector<8x128xf32>
    %328 = tpu.matmul %325, %327, %cst_169 {dimension_numbers = #tpu.dot_dimension_numbers<[1], [0], [0], [1], [0, 0, 1, 1], [], []>} : vector<8x8xf32>, vector<8x128xf32>, vector<8x128xf32> -> vector<8x128xf32>
    %329 = arith.addf %326, %328 : vector<8x128xf32>
    %c28 = arith.constant 28 : index
    %c0_170 = arith.constant 0 : index
    %330 = vector.load %arg8[%c28, %c0_170] : memref<32x128xf32, #tpu.memory_space<vmem>>, vector<1x128xf32>
    %331 = vector.broadcast %330 : vector<1x128xf32> to vector<8x128xf32>
    %332 = arith.addf %329, %331 : vector<8x128xf32>
    %c0_171 = arith.constant 0 : index
    %c0_172 = arith.constant 0 : index
    %333 = vector.load %arg3[%c0_171, %c0_172] : memref<8x128xf32, #tpu.memory_space<vmem>>, vector<8x128xf32>
    %cst_173 = arith.constant 0.000000e+00 : f32
    %334 = vector.broadcast %cst_173 : f32 to vector<8x128xf32>
    %335 = arith.cmpf oeq, %333, %334 : vector<8x128xf32>
    %cst_174 = arith.constant 0xFF800000 : f32
    %336 = vector.broadcast %cst_174 : f32 to vector<8x128xf32>
    %337 = arith.select %335, %332, %336 : vector<8x128xi1>, vector<8x128xf32>
    %c0_175 = arith.constant 0 : index
    %c0_176 = arith.constant 0 : index
    %338 = vector.load %arg9[%c0_175, %c0_176] : memref<8x128xf32, #tpu.memory_space<vmem>>, vector<8x128xf32>
    tpu.vector_store %arg9[%c0_175, %c0_176], %337 {strides = array<i32>} : memref<8x128xf32, #tpu.memory_space<vmem>>, vector<8x128xf32>,
    return
  }
  func.func @transform_0(%arg0: i32) -> (i32, i32) {
    %c0_i32 = arith.constant 0 : i32
    %c0_i32_0 = arith.constant 0 : i32
    return %arg0, %c0_i32 : i32, i32
  }
  func.func @transform_1(%arg0: i32) -> (i32, i32, i32) {
    %c0_i32 = arith.constant 0 : i32
    %c0_i32_0 = arith.constant 0 : i32
    %c0_i32_1 = arith.constant 0 : i32
    return %arg0, %c0_i32, %c0_i32_0 : i32, i32, i32
  }
  func.func @transform_2(%arg0: i32) -> (i32, i32) {
    %c0_i32 = arith.constant 0 : i32
    %c0_i32_0 = arith.constant 0 : i32
    return %arg0, %c0_i32 : i32, i32
  }
  func.func @transform_3(%arg0: i32) -> (i32, i32, i32) {
    %c0_i32 = arith.constant 0 : i32
    %c0_i32_0 = arith.constant 0 : i32
    %c0_i32_1 = arith.constant 0 : i32
    %c0_i32_2 = arith.constant 0 : i32
    return %c0_i32, %c0_i32_0, %c0_i32_1 : i32, i32, i32
  }
  func.func @transform_4(%arg0: i32) -> (i32, i32, i32) {
    %c0_i32 = arith.constant 0 : i32
    %c0_i32_0 = arith.constant 0 : i32
    %c0_i32_1 = arith.constant 0 : i32
    %c0_i32_2 = arith.constant 0 : i32
    return %c0_i32, %c0_i32_0, %c0_i32_1 : i32, i32, i32
  }
  func.func @transform_5(%arg0: i32) -> (i32, i32, i32) {
    %c0_i32 = arith.constant 0 : i32
    %c0_i32_0 = arith.constant 0 : i32
    %c0_i32_1 = arith.constant 0 : i32
    %c0_i32_2 = arith.constant 0 : i32
    return %c0_i32, %c0_i32_0, %c0_i32_1 : i32, i32, i32
  }
  func.func @transform_6(%arg0: i32) -> (i32, i32) {
    %c0_i32 = arith.constant 0 : i32
    %c0_i32_0 = arith.constant 0 : i32
    %c0_i32_1 = arith.constant 0 : i32
    return %c0_i32, %c0_i32_0 : i32, i32
  }
  func.func @transform_7(%arg0: i32) -> (i32, i32) {
    %c0_i32 = arith.constant 0 : i32
    %c0_i32_0 = arith.constant 0 : i32
    %c0_i32_1 = arith.constant 0 : i32
    return %c0_i32, %c0_i32_0 : i32, i32
  }
  func.func @transform_8(%arg0: i32) -> (i32, i32) {
    %c0_i32 = arith.constant 0 : i32
    %c0_i32_0 = arith.constant 0 : i32
    return %arg0, %c0_i32 : i32, i32
  }
}

</mosaic_0001>

<bundles_post_ra>
// kernel: forward.1
= control target key start
LH: loop header
LB: loop body
LE: loop exit
PB: predicated region body
PF: predicated region fallthrough
CT: control target
= control target key end

     0   :  { %s3614_s27 = smov 0   ;;  %s4228_s0 = inlined_call_operand.vmem [shape: f32[16,32], index: 0, kind: input, shape index: {}]   ;;  %s4229_s1 = inlined_call_operand.vmem [shape: f32[2,1,8], index: 1, kind: input, shape index: {}]   ;;  %s4230_s2 = inlined_call_operand.vmem [shape: f32[16,128], index: 2, kind: input, shape index: {}]   ;;  %s4231_s3 = inlined_call_operand.vmem [shape: f32[12,32,16], index: 3, kind: input, shape index: {}]   ;;  %s4232_s4 = inlined_call_operand.vmem [shape: f32[4,16,32], index: 4, kind: input, shape index: {}]   ;;  %s4233_s5 = inlined_call_operand.vmem [shape: f32[2,96,64], index: 5, kind: input, shape index: {}]   ;;  %s4234_s6 = inlined_call_operand.vmem [shape: f32[32,256], index: 6, kind: input, shape index: {}]   ;;  %s4235_s7 = inlined_call_operand.vmem [shape: f32[32,128], index: 7, kind: input, shape index: {}]   ;;  %s4236_s8 = inlined_call_operand.vmem [shape: f32[16,128], index: 8, kind: output, shape index: {}]  }
   0x1 LB: > { %s2999_s28 = sadd.s32 4294967295, %s3565_s27   ;;  %p3003_p0 = scmp.ge.s32.totalorder %s3565_s27, 1  ;;  %s3565_s27 = sphi %s3614_s27, %s18_s27  }
   0x2   : > { %p278_p1 = scmp.lt.s32.totalorder %s3565_s27, 3 }
   0x4   : > { %p279_p2 = pnand %p3003_p0, %p278_p1 }
   0x5   : > { %p317_p3 = scmp.lt.s32.totalorder (!%p279_p2), %s2999_s28, 1 }
   0x6   : > { %282 = sbr.rel (%p279_p2) target bundleno = 6410 (0x190a), region = 52 }
   0xb   : > { %s4238_s28 = smov (!%p317_p3, %s2999_s28), 1  ;;  %vm338_vm0 = vcmask 261120   ;;  %v3567_v7 = vmov 0.0   ;;  %v366_v8 = vld [vmem:[%s4231_s3 + $0x18] sm:$0xff]  ;;  %v365_v10 = vld [vmem:[%s4231_s3 + $0x10] sm:$0xff]  ;;  %v364_v12 = vld [vmem:[%s4231_s3 + $0x8] sm:$0xff]  ;;  %v684_v53 = vlaneseq }
   0xc   : > { %s3625_s29 = sshll.u32 %s4238_s28, 3  ;;  %3254 = vmatprep.subr.mxu0 %v3567_v7  ;;  %3265 = vmatprep.subr.mxu1 %v3567_v7  ;;  %v3015_v9 = vld [vmem:[%s4231_s3 + $0x38] sm:$0xff]  ;;  %v3014_v11 = vld [vmem:[%s4231_s3 + $0x30] sm:$0xff]  ;;  %v3013_v13 = vld [vmem:[%s4231_s3 + $0x28] sm:$0xff]  ;;  %vm3568_vm1 = vmmov 0   ;;  %vm605_vm2 = vcmask 130048   ;;  %s323_s25 = scalar_lea.vmem %s4229_s1, %s4238_s28 }
   0xd   : > { %s320_s10 = scalar_lea.vmem %s4228_s0, %s3625_s29  ;;  %3255 = vmatpush3.msra.mxu0 %v366_v8  ;;  %3266 = vmatpush3.msra.mxu1 %v3015_v9  ;;  %v363_v14 = vld [vmem:[%s4231_s3] sm:$0xff]  ;;  %v3021_v25 = vld [vmem:[%s4231_s3 + $0x58] sm:$0xff]  ;;  %v3020_v26 = vld [vmem:[%s4231_s3 + $0x50] sm:$0xff]  ;;  %v3767_v56 = vshrl.u32 %v684_v53, 7  ;;  %vm690_vm3 = vcmask 64512   ;;  %vm1460_vm4 = vcmask 523264   ;;  %s331_s15 = scalar_lea.vmem %s4236_s8, %s3625_s29 }
   0xe   : > { %v335_v0 = vld [vmem:[%s320_s10] sm:$0xff]  ;;  %3256 = vmatprep.subr.mxu0 %v3567_v7  ;;  %3267 = vmatprep.subr.mxu1 %v3567_v7  ;;  %v3019_v27 = vld [vmem:[%s4231_s3 + $0x48] sm:$0xff]  ;;  %v3030_v29 = vld [vmem:[%s4231_s3 + $0x78] sm:$0xff]  ;;  %s327_s10 = scalar_lea.vmem %s4230_s2, %s3625_s29 }
   0xf   : > { %v339_v1 = vsel %vm338_vm0, %v335_v0, 0.0  ;;  %3257 = vmatpush3.msra.mxu0 %v365_v10  ;;  %3268 = vmatpush3.msra.mxu1 %v3014_v11  ;;  %v3012_v15 = vld [vmem:[%s4231_s3 + $0x20] sm:$0xff]  ;;  %v3029_v30 = vld [vmem:[%s4231_s3 + $0x70] sm:$0xff]  ;;  %v3028_v31 = vld [vmem:[%s4231_s3 + $0x68] sm:$0xff]  ;;  %v686_v58 = vsub.s32 0, %v3767_v56 }
  0x10   : > { %340 = vadd.xlane.f32.xlu0 %v339_v1  ;;  %3258 = vmatprep.subr.mxu0 %v3567_v7  ;;  %v3008_v20 = vld [vmem:[%s4235_s7] ss:$0 sm:$0xff]  ;;  %v3009_v22 = vld [vmem:[%s4235_s7 + $0x1] ss:$0 sm:$0xff]  ;;  %v3042_v33 = vld [vmem:[%s4231_s3 + $0xb8] sm:$0xff] }
  0x11   : > { %3259 = vmatpush3.msra.mxu0 %v364_v12  ;;  %3269 = vmatprep.subr.mxu1 %v3567_v7  ;;  %v3018_v28 = vld [vmem:[%s4231_s3 + $0x40] sm:$0xff]  ;;  %v3041_v34 = vld [vmem:[%s4231_s3 + $0xb0] sm:$0xff]  ;;  %v3040_v35 = vld [vmem:[%s4231_s3 + $0xa8] sm:$0xff] }
  0x12   : > { %3260 = vmatprep.subr.mxu0 %v3567_v7  ;;  %3270 = vmatpush3.msra.mxu1 %v3013_v13  ;;  %v3027_v32 = vld [vmem:[%s4231_s3 + $0x60] sm:$0xff]  ;;  %v3036_v10 = vld [vmem:[%s4231_s3 + $0x98] sm:$0xff]  ;;  %v3035_v11 = vld [vmem:[%s4231_s3 + $0x90] sm:$0xff] }
  0x13   : > { %3261 = vmatpush3.msra.mxu0 %v363_v14  ;;  %3271 = vmatprep.subr.mxu1 %v3567_v7  ;;  %v3039_v36 = vld [vmem:[%s4231_s3 + $0xa0] sm:$0xff]  ;;  %v3034_v12 = vld [vmem:[%s4231_s3 + $0x88] sm:$0xff] }
  0x14   : > { %3262 = vmatprep.mubr.msk.f32.mxu0 %vm3568_vm1, %v3567_v7  ;;  %3272 = vmatpush3.msra.mxu1 %v3012_v15  ;;  %v3016_v37 = vld [vmem:[%s4235_s7 + $0x3] ss:$0 sm:$0xff]  ;;  %v3010_v40 = vld [vmem:[%s4235_s7 + $0x2] ss:$0 sm:$0xff]  ;;  %v3022_v45 = vld [vmem:[%s4235_s7 + $0x4] ss:$0 sm:$0xff] }
  0x15   : > { %3273 = vmatprep.mubr.msk.f32.mxu1 %vm3568_vm1, %v3567_v7  ;;  %3276 = vmatprep.subr.mxu0 %v3567_v7  ;;  %v332_v54 = vld [vmem:[%s323_s25] sm:$0x1] }
  0x16   : > { %3287 = vmatprep.subr.mxu1 %v3567_v7  ;;  %v3007_v55 = vadd.f32 -1.0, %v332_v54  ;;  %v3033_v13 = vld [vmem:[%s4231_s3 + $0x80] sm:$0xff] }
  0x18   : > { %v334_v57 = vmul.f32 1e+09, %v3007_v55 }
  0x1a   : > { %v3770_v59 = vrot.slane %v334_v57, %v686_v58 }
  0x99   : > { %v341_v2 = vpop.xlane.xlu0 %340 }
  0x9a   : > { %v343_v3 = vmul.f32 0.03125, %v341_v2 }
  0x9c   : > { %v344_v4 = vsub.f32 %v335_v0, %v343_v3 }
  0x9e   : > { %v345_v5 = vmul.f32 %v344_v4, %v344_v4 }
  0xa0   : > { %v346_v6 = vsel %vm338_vm0, %v345_v5, 0.0 }
  0xa1   : > { %347 = vadd.xlane.f32.xlu0 %v346_v6 }
 0x12a   : > { %v348_v16 = vpop.xlane.xlu0 %347 }
 0x12b   : > { %v349_v17 = vmul.f32 0.03125, %v348_v16  ;;  %v3037_v16 = vld [vmem:[%s4235_s7 + $0x6] ss:$0 sm:$0xff] }
 0x12d   : > { %v350_v18 = vadd.f32 1e-12, %v349_v17 }
 0x12f   : > { %3529 = vrsqrt.f32 %v350_v18  ;;  %v3031_v18 = vld [vmem:[%s4235_s7 + $0x5] ss:$0 sm:$0xff] }
 0x13c   : > { %v3530_v19 = vpop.eup %3529 }
 0x13d   : > { %v352_v21 = vmul.f32 %v3530_v19, %v344_v4 }
 0x13f   : > { %v357_v23 = vmul.f32 %v3008_v20, %v352_v21  ;;  %v3043_v20 = vld [vmem:[%s4235_s7 + $0x7] ss:$0 sm:$0xff] }
 0x141   : > { %v3677_v24 = vadd.f32 %v3009_v22, %v357_v23 }
 0x143   : > { %3263 = vmatmul.mubr.msk.f32.vlgmr.msra.gmra.mxu0 %vm338_vm0, %v3677_v24  ;;  %3274 = vmatmul.mubr.msk.f32.vlgmr.msra.gmra.mxu1 %vm338_vm0, %v3677_v24 }
 0x144   : > { %3277 = vmatpush3.msra.mxu0 %v3021_v25  ;;  %3284 = vmatprep.mubr.msk.f32.mxu0 %vm3568_vm1, %v3567_v7 }
 0x145   : > { %3278 = vmatprep.subr.mxu0 %v3567_v7  ;;  %3289 = vmatprep.mubr.msk.f32.mxu1 %vm3568_vm1, %v3567_v7 }
 0x146   : > { %3279 = vmatpush3.msra.mxu0 %v3020_v26 }
 0x147   : > { %3280 = vmatprep.subr.mxu0 %v3567_v7 }
 0x148   : > { %3281 = vmatpush3.msra.mxu0 %v3019_v27 }
 0x149   : > { %3282 = vmatprep.subr.mxu0 %v3567_v7 }
 0x14a   : > { %3283 = vmatpush3.msra.mxu0 %v3018_v28 }
 0x14b   : > { %3285 = vmatmul.mubr.msk.f32.vlgmr.msra.gmra.mxu0 %vm338_vm0, %v3677_v24  ;;  %3297 = vmatprep.subr.mxu0 %v3567_v7 }
 0x14c   : > { %3298 = vmatpush3.msra.mxu0 %v3030_v29  ;;  %3305 = vmatprep.mubr.msk.f32.mxu0 %vm3568_vm1, %v3567_v7 }
 0x14d   : > { %3299 = vmatprep.subr.mxu0 %v3567_v7 }
 0x14e   : > { %3300 = vmatpush3.msra.mxu0 %v3029_v30 }
 0x14f   : > { %3301 = vmatprep.subr.mxu0 %v3567_v7 }
 0x150   : > { %3302 = vmatpush3.msra.mxu0 %v3028_v31 }
 0x151   : > { %3303 = vmatprep.subr.mxu0 %v3567_v7 }
 0x152   : > { %3304 = vmatpush3.msra.mxu0 %v3027_v32 }
 0x153   : > { %3306 = vmatmul.mubr.msk.f32.vlgmr.msra.gmra.mxu0 %vm338_vm0, %v3677_v24  ;;  %3319 = vmatprep.subr.mxu0 %v3567_v7 }
 0x154   : > { %3320 = vmatpush3.msra.mxu0 %v3042_v33  ;;  %3327 = vmatprep.mubr.msk.f32.mxu0 %vm3568_vm1, %v3567_v7 }
 0x155   : > { %3321 = vmatprep.subr.mxu0 %v3567_v7 }
 0x156   : > { %3322 = vmatpush3.msra.mxu0 %v3041_v34 }
 0x157   : > { %3323 = vmatprep.subr.mxu0 %v3567_v7 }
 0x158   : > { %3324 = vmatpush3.msra.mxu0 %v3040_v35  ;;  %v3049_v35 = vld [vmem:[%s4232_s4 + $0x18] sm:$0xff] }
 0x159   : > { %3325 = vmatprep.subr.mxu0 %v3567_v7 }
 0x15a   : > { %3326 = vmatpush3.msra.mxu0 %v3039_v36 }
 0x15b   : > { %3328 = vmatmul.mubr.msk.f32.vlgmr.msra.gmra.mxu0 %vm338_vm0, %v3677_v24  ;;  %3340 = vmatprep.subr.mxu0 %v3567_v7 }
 0x15c   : > { %3344 = vmatprep.mubr.msk.f32.mxu0 %vm3568_vm1, %v3567_v7  ;;  %3341 = vmatpush3.msra.mxu0 %v3049_v35 }
 0x15d   : > { %3342 = vmatprep.subr.mxu0 %v3567_v7 }
 0x203   : > { %v441_v38 = vpop.f32.mrf.mxu0  ;;  %v521_v39 = vpop.f32.mrf.mxu1 }
 0x204   : > { %v522_v41 = vadd.f32 %v3016_v37, %v521_v39  ;;  %v442_v44 = vadd.f32 %v3010_v40, %v441_v38  ;;  %v776_v39 = vld [vmem:[%s4232_s4 + $0x8] sm:$0xff]  ;;  %v775_v40 = vld [vmem:[%s4232_s4] sm:$0xff] }
 0x205   : > { %v3264_v42 = vpop.f32.mrf.mxu0  ;;  %v3275_v43 = vpop.f32.mrf.mxu1 }
 0x206   : > { %3288 = vmatpush3.xpose.msk.msra.mxu1 %vm605_vm2, %v522_v41  ;;  %v3048_v41 = vld [vmem:[%s4232_s4 + $0x10] sm:$0xff] }
 0x207   : > { %3292 = vmatprep.subr.mxu1 %v3567_v7  ;;  %3343 = vmatpush3.msra.mxu0 %v3048_v41  ;;  %v3063_v41 = vld [vmem:[%s4231_s3 + $0xd0] sm:$0xff] }
 0x208   : > { %3354 = vmatprep.subr.mxu0 %v3567_v7 }
 0x209   : > { %3290 = vmatmul.mubr.msk.f32.vlgmr.msra.gmra.mxu1 %vm605_vm2, %v442_v44 }
 0x20a   : > { %3294 = vmatprep.mubr.msk.f32.mxu1 %vm3568_vm1, %v3567_v7 }
 0x20b   : > { %v601_v46 = vpop.f32.mrf.mxu0 }
 0x20c   : > { %v602_v47 = vadd.f32 %v3022_v45, %v601_v46 }
 0x20d   : > { %v3286_v48 = vpop.f32.mrf.mxu0 }
 0x20e   : > { %3293 = vmatpush3.msra.mxu1 %v602_v47  ;;  %v3052_v47 = vld [vmem:[%s4235_s7 + $0x8] ss:$0 sm:$0xff] }
 0x20f   : > { %3308 = vmatprep.subr.mxu1 %v3567_v7 }
 0x213   : > { %v853_v49 = vpop.f32.mrf.mxu0 }
 0x214   : > { %v854_v22 = vadd.f32 %v3031_v18, %v853_v49  ;;  %v3055_v18 = vld [vmem:[%s4235_s7 + $0xb] ss:$0 sm:$0xff] }
 0x215   : > { %v3307_v50 = vpop.f32.mrf.mxu0 }
 0x21b   : > { %v1013_v51 = vpop.f32.mrf.mxu0 }
 0x21c   : > { %v1014_v23 = vadd.f32 %v3043_v20, %v1013_v51 }
 0x21d   : > { %v3329_v52 = vpop.f32.mrf.mxu0 }
 0x2c9   : > { %v678_v60 = vpop.f32.mrf.mxu1 }
 0x2ca   : > { %v682_v61 = vmul.f32 0.25, %v678_v60 }
 0x2cb   : > { %v3291_v62 = vpop.f32.mrf.mxu1 }
 0x2cc   : > { %v689_v63 = vadd.f32 %v3770_v59, %v682_v61  ;;  %v1363_v61 = vld [vmem:[%s4233_s5 + $0x18] sm:$0xff]  ;;  %v1361_v62 = vld [vmem:[%s4233_s5 + $0x8] sm:$0xff] }
 0x2ce   : > { %v691_v0 = vsel %vm690_vm3, %v689_v63, -inf }
 0x2cf   : > { %692 = vmax.xlane.f32.xlu1 %v691_v0 }
 0x358   : > { %v693_v1 = vpop.xlane.xlu1 %692 }
 0x359   : > { %v694_v2 = vsub.f32 %v689_v63, %v693_v1  ;;  %v1360_v63 = vld [vmem:[%s4233_s5] sm:$0xff] }
 0x35b   : > { %v695_v3 = vmul.f32 1.442695, %v694_v2 }
 0x35d   : > { %3531 = vpow2.f32 %v695_v3 }
 0x36a   : > { %v3532_v4 = vpop.eup %3531 }
 0x36b   : > { %v697_v5 = vsel %vm690_vm3, %v3532_v4, 0.0 }
 0x36c   : > { %698 = vadd.xlane.f32.xlu1 %v697_v5 }
 0x3f5   : > { %v699_v6 = vpop.xlane.xlu1 %698 }
 0x3f6   : > { %3533 = vrcp.f32 %v699_v6  ;;  %v3054_v6 = vld [vmem:[%s4235_s7 + $0xa] ss:$0 sm:$0xff] }
 0x403   : > { %v3534_v8 = vpop.eup %3533 }
 0x404   : > { %v701_v9 = vmul.f32 %v3534_v8, %v3532_v4  ;;  %v3053_v4 = vld [vmem:[%s4235_s7 + $0x9] ss:$0 sm:$0xff] }
 0x406   : > { %3295 = vmatmul.mubr.msk.f32.vlgmr.msra.gmra.mxu1 %vm690_vm3, %v701_v9 }
 0x407   : > { %3309 = vmatpush3.msra.mxu1 %v3036_v10  ;;  %3316 = vmatprep.mubr.msk.f32.mxu1 %vm3568_vm1, %v3567_v7  ;;  %v1454_v10 = vld [vmem:[%s4233_s5 + $0x58] sm:$0xff] }
 0x408   : > { %3310 = vmatprep.subr.mxu1 %v3567_v7 }
 0x409   : > { %3311 = vmatpush3.msra.mxu1 %v3035_v11  ;;  %v1453_v11 = vld [vmem:[%s4233_s5 + $0x50] sm:$0xff] }
 0x40a   : > { %3312 = vmatprep.subr.mxu1 %v3567_v7 }
 0x40b   : > { %3313 = vmatpush3.msra.mxu1 %v3034_v12  ;;  %v1452_v12 = vld [vmem:[%s4233_s5 + $0x48] sm:$0xff] }
 0x40c   : > { %3314 = vmatprep.subr.mxu1 %v3567_v7 }
 0x40d   : > { %3315 = vmatpush3.msra.mxu1 %v3033_v13  ;;  %v1451_v13 = vld [vmem:[%s4233_s5 + $0x40] sm:$0xff] }
 0x40e   : > { %3317 = vmatmul.mubr.msk.f32.vlgmr.msra.gmra.mxu1 %vm338_vm0, %v3677_v24  ;;  %3330 = vmatprep.subr.mxu1 %v3567_v7 }
 0x40f   : > { %3332 = vmatprep.mubr.msk.f32.mxu1 %vm3568_vm1, %v3567_v7 }
 0x4c6   : > { %v771_v14 = vpop.f32.mrf.mxu1 }
 0x4c8   : > { %v3296_v15 = vpop.f32.mrf.mxu1 }
 0x4c9   : > { %v1449_v15 = vld [vmem:[%s4233_s5 + $0x30] sm:$0xff] }
 0x4ce   : > { %v933_v17 = vpop.f32.mrf.mxu1 }
 0x4cf   : > { %v934_v19 = vadd.f32 %v3037_v16, %v933_v17  ;;  %v1448_v16 = vld [vmem:[%s4233_s5 + $0x28] sm:$0xff]  ;;  %v1447_v17 = vld [vmem:[%s4233_s5 + $0x20] sm:$0xff] }
 0x4d0   : > { %v3318_v21 = vpop.f32.mrf.mxu1 }
 0x4d1   : > { %3331 = vmatpush3.xpose.msk.msra.mxu1 %vm605_vm2, %v934_v19 }
 0x4d2   : > { %3335 = vmatprep.subr.mxu1 %v3567_v7 }
 0x4d4   : > { %3333 = vmatmul.mubr.msk.f32.vlgmr.msra.gmra.mxu1 %vm605_vm2, %v854_v22 }
 0x4d5   : > { %3336 = vmatpush3.msra.mxu1 %v1014_v23  ;;  %3337 = vmatprep.mubr.msk.f32.mxu1 %vm3568_vm1, %v3567_v7 }
 0x4d6   : > { %3347 = vmatprep.subr.mxu1 %v3567_v7 }
 0x594   : > { %v1089_v25 = vpop.f32.mrf.mxu1 }
 0x595   : > { %v1093_v26 = vmul.f32 0.25, %v1089_v25 }
 0x596   : > { %v3334_v27 = vpop.f32.mrf.mxu1 }
 0x597   : > { %v1094_v28 = vadd.f32 %v1093_v26, %v3770_v59 }
 0x599   : > { %v1095_v29 = vsel %vm690_vm3, %v1094_v28, -inf }
 0x59a   : > { %1096 = vmax.xlane.f32.xlu0 %v1095_v29 }
 0x623   : > { %v1097_v30 = vpop.xlane.xlu0 %1096 }
 0x624   : > { %v1098_v31 = vsub.f32 %v1094_v28, %v1097_v30  ;;  %v3057_v28 = vld [vmem:[%s4235_s7 + $0xc] ss:$0 sm:$0xff] }
 0x626   : > { %v1099_v32 = vmul.f32 1.442695, %v1098_v31 }
 0x628   : > { %3535 = vpow2.f32 %v1099_v32 }
 0x635   : > { %v3536_v33 = vpop.eup %3535 }
 0x636   : > { %v1101_v34 = vsel %vm690_vm3, %v3536_v33, 0.0 }
 0x637   : > { %1102 = vadd.xlane.f32.xlu1 %v1101_v34 }
 0x6c0   : > { %v1103_v36 = vpop.xlane.xlu1 %1102 }
 0x6c1   : > { %3537 = vrcp.f32 %v1103_v36 }
 0x6ce   : > { %v3538_v37 = vpop.eup %3537 }
 0x6cf   : > { %v1105_v38 = vmul.f32 %v3538_v37, %v3536_v33 }
 0x6d1   : > { %3338 = vmatmul.mubr.msk.f32.vlgmr.msra.gmra.mxu1 %vm690_vm3, %v1105_v38 }
 0x6d2   : > { %3348 = vmatpush3.msra.mxu1 %v776_v39  ;;  %3351 = vmatprep.mubr.msk.f32.mxu1 %vm3568_vm1, %v3567_v7  ;;  %v3064_v39 = vld [vmem:[%s4231_s3 + $0xd8] sm:$0xff] }
 0x6d3   : > { %3349 = vmatprep.subr.mxu1 %v3567_v7 }
 0x6d4   : > { %3350 = vmatpush3.msra.mxu1 %v775_v40  ;;  %v3076_v40 = vld [vmem:[%s4231_s3 + $0x118] sm:$0xff] }
 0x6d5   : > { %3352 = vmatmul.mubr.msk.f32.vlgmr.msra.gmra.mxu1 %vm605_vm2, %v771_v14  ;;  %3365 = vmatprep.subr.mxu1 %v3567_v7  ;;  %v1450_v14 = vld [vmem:[%s4233_s5 + $0x38] sm:$0xff] }
 0x6d6   : > { %3381 = vmatprep.mubr.msk.f32.mxu1 %vm3568_vm1, %v3567_v7  ;;  %3366 = vmatpush3.msra.mxu1 %v1454_v10 }
 0x6d7   : > { %3367 = vmatprep.subr.mxu1 %v3567_v7 }
 0x6d8   : > { %3368 = vmatpush3.msra.mxu1 %v1453_v11  ;;  %v3087_v11 = vld [vmem:[%s4231_s3 + $0x138] sm:$0xff] }
 0x6d9   : > { %3369 = vmatprep.subr.mxu1 %v3567_v7 }
 0x6da   : > { %3370 = vmatpush3.msra.mxu1 %v1452_v12  ;;  %v3086_v12 = vld [vmem:[%s4231_s3 + $0x130] sm:$0xff] }
 0x6db   : > { %3371 = vmatprep.subr.mxu1 %v3567_v7 }
 0x6dc   : > { %3372 = vmatpush3.msra.mxu1 %v1451_v13  ;;  %v3085_v13 = vld [vmem:[%s4231_s3 + $0x128] sm:$0xff] }
 0x6dd   : > { %3373 = vmatprep.subr.mxu1 %v3567_v7 }
 0x6de   : > { %3374 = vmatpush3.msra.mxu1 %v1450_v14  ;;  %v3084_v14 = vld [vmem:[%s4231_s3 + $0x120] sm:$0xff] }
 0x6df   : > { %3375 = vmatprep.subr.mxu1 %v3567_v7 }
 0x6e0   : > { %3376 = vmatpush3.msra.mxu1 %v1449_v15  ;;  %v3099_v15 = vld [vmem:[%s4231_s3 + $0x178] sm:$0xff] }
 0x6e1   : > { %3377 = vmatprep.subr.mxu1 %v3567_v7 }
 0x6e2   : > { %3378 = vmatpush3.msra.mxu1 %v1448_v16  ;;  %v3098_v16 = vld [vmem:[%s4231_s3 + $0x170] sm:$0xff] }
 0x6e3   : > { %3379 = vmatprep.subr.mxu1 %v3567_v7 }
 0x6e4   : > { %3380 = vmatpush3.msra.mxu1 %v1447_v17  ;;  %v3097_v17 = vld [vmem:[%s4231_s3 + $0x168] sm:$0xff] }
 0x6e5   : > { %3406 = vmatprep.subr.mxu1 %v3567_v7 }
 0x791   : > { %v1175_v42 = vpop.f32.mrf.mxu1 }
 0x792   : > { %3345 = vmatmul.mubr.msk.f32.vlgmr.msra.gmra.mxu0 %vm605_vm2, %v1175_v42  ;;  %v3075_v42 = vld [vmem:[%s4231_s3 + $0x110] sm:$0xff] }
 0x793   : > { %v3339_v43 = vpop.f32.mrf.mxu1  ;;  %3362 = vmatprep.mubr.msk.f32.mxu0 %vm3568_vm1, %v3567_v7  ;;  %3355 = vmatpush3.msra.mxu0 %v1363_v61  ;;  %v3068_v61 = vld [vmem:[%s4231_s3 + $0xe8] sm:$0xff] }
 0x794   : > { %3356 = vmatprep.subr.mxu0 %v3567_v7  ;;  %v3062_v43 = vld [vmem:[%s4231_s3 + $0xc8] sm:$0xff] }
 0x795   : > { %v1324_v44 = vpop.f32.mrf.mxu1 }
 0x797   : > { %v3353_v45 = vpop.f32.mrf.mxu1 }
 0x798   : > { %v3061_v45 = vld [vmem:[%s4231_s3 + $0xc0] sm:$0xff] }
 0x852   : > { %v1251_v46 = vpop.f32.mrf.mxu0 }
 0x853   : > { %v1325_v48 = vadd.f32 %v1324_v44, %v1251_v46  ;;  %v3074_v44 = vld [vmem:[%s4231_s3 + $0x108] sm:$0xff]  ;;  %v3073_v46 = vld [vmem:[%s4231_s3 + $0x100] sm:$0xff] }
 0x854   : > { %v3346_v49 = vpop.f32.mrf.mxu0 }
 0x855   : > { %v1333_v50 = vadd.f32 %v3052_v47, %v1325_v48 }
 0x857   : > { %v1334_v51 = vadd.f32 %v1333_v50, %v3677_v24  ;;  %v1362_v24 = vld [vmem:[%s4233_s5 + $0x10] sm:$0xff] }
 0x858   : > { %3357 = vmatpush3.msra.mxu0 %v1362_v24  ;;  %v3067_v24 = vld [vmem:[%s4231_s3 + $0xe0] sm:$0xff] }
 0x859   : > { %v1337_v52 = vsel %vm338_vm0, %v1334_v51, 0.0  ;;  %3358 = vmatprep.subr.mxu0 %v3567_v7 }
 0x85a   : > { %1338 = vadd.xlane.f32.xlu0 %v1337_v52  ;;  %3359 = vmatpush3.msra.mxu0 %v1361_v62  ;;  %v3077_v62 = vld [vmem:[%s4235_s7 + $0x11] ss:$0 sm:$0xff] }
 0x85b   : > { %3360 = vmatprep.subr.mxu0 %v3567_v7 }
 0x85c   : > { %3361 = vmatpush3.msra.mxu0 %v1360_v63 }
 0x85d   : > { %3384 = vmatprep.subr.mxu0 %v3567_v7 }
 0x8e3   : > { %v1339_v54 = vpop.xlane.xlu0 %1338 }
 0x8e4   : > { %v1340_v55 = vmul.f32 0.03125, %v1339_v54  ;;  %v3060_v54 = vld [vmem:[%s4235_s7 + $0xe] ss:$0 sm:$0xff] }
 0x8e6   : > { %v1341_v57 = vsub.f32 %v1334_v51, %v1340_v55  ;;  %v3059_v51 = vld [vmem:[%s4235_s7 + $0xd] ss:$0 sm:$0xff] }
 0x8e8   : > { %v1342_v58 = vmul.f32 %v1341_v57, %v1341_v57 }
 0x8ea   : > { %v1343_v60 = vsel %vm338_vm0, %v1342_v58, 0.0  ;;  %v3070_v58 = vld [vmem:[%s4231_s3 + $0xf8] sm:$0xff] }
 0x8eb   : > { %1344 = vadd.xlane.f32.xlu1 %v1343_v60  ;;  %v3069_v60 = vld [vmem:[%s4231_s3 + $0xf0] sm:$0xff] }
 0x974   : > { %v1345_v0 = vpop.xlane.xlu1 %1344 }
 0x975   : > { %v1346_v1 = vmul.f32 0.03125, %v1345_v0 }
 0x977   : > { %v1347_v2 = vadd.f32 1e-12, %v1346_v1 }
 0x979   : > { %3539 = vrsqrt.f32 %v1347_v2 }
 0x986   : > { %v3540_v3 = vpop.eup %3539 }
 0x987   : > { %v1349_v5 = vmul.f32 %v3540_v3, %v1341_v57 }
 0x989   : > { %v1354_v8 = vmul.f32 %v3053_v4, %v1349_v5  ;;  %v3071_v4 = vld [vmem:[%s4235_s7 + $0x10] ss:$0 sm:$0xff] }
 0x98b   : > { %v1359_v9 = vadd.f32 %v3054_v6, %v1354_v8  ;;  %v3065_v6 = vld [vmem:[%s4235_s7 + $0xf] ss:$0 sm:$0xff] }
 0x98d   : > { %3363 = vmatmul.mubr.msk.f32.vlgmr.msra.gmra.mxu0 %vm338_vm0, %v1359_v9 }
 0x98e   : > { %3392 = vmatprep.mubr.msk.f32.mxu0 %vm3568_vm1, %v3567_v7  ;;  %3385 = vmatpush3.msra.mxu0 %v3064_v39  ;;  %v3091_v39 = vld [vmem:[%s4231_s3 + $0x148] sm:$0xff] }
 0x98f   : > { %3386 = vmatprep.subr.mxu0 %v3567_v7 }
 0x990   : > { %3387 = vmatpush3.msra.mxu0 %v3063_v41 }
 0x991   : > { %3388 = vmatprep.subr.mxu0 %v3567_v7 }
 0x992   : > { %3389 = vmatpush3.msra.mxu0 %v3062_v43  ;;  %v3094_v43 = vld [vmem:[%s4235_s7 + $0x13] ss:$0 sm:$0xff] }
 0x993   : > { %3390 = vmatprep.subr.mxu0 %v3567_v7 }
 0x994   : > { %3391 = vmatpush3.msra.mxu0 %v3061_v45  ;;  %v3088_v45 = vld [vmem:[%s4235_s7 + $0x12] ss:$0 sm:$0xff] }
 0x995   : > { %3395 = vmatprep.subr.mxu0 %v3567_v7 }
 0xa4d   : > { %v1438_v19 = vpop.f32.mrf.mxu0 }
 0xa4e   : > { %v1439_v20 = vadd.f32 %v3055_v18, %v1438_v19  ;;  %v3096_v18 = vld [vmem:[%s4231_s3 + $0x160] sm:$0xff] }
 0xa4f   : > { %v3364_v21 = vpop.f32.mrf.mxu0 }
 0xa50   : > { %v1443_v22 = vmul.f32 0.70710677, %v1439_v20  ;;  %v1442_v25 = vmul.f32 0.5, %v1439_v20 }
 0xa52   : > { %3541 = verf.f32 %v1443_v22 }
 0xa5f   : > { %v3542_v23 = vpop.eup %3541 }
 0xa60   : > { %v1445_v26 = vadd.f32 1.0, %v3542_v23 }
 0xa62   : > { %v1446_v27 = vmul.f32 %v1445_v26, %v1442_v25 }
 0xa64   : > { %3382 = vmatmul.mubr.msk.f32.vlgmr.msra.gmra.mxu1 %vm1460_vm4, %v1446_v27 }
 0xa65   : > { %3414 = vmatprep.mubr.msk.f32.mxu1 %vm3568_vm1, %v3567_v7  ;;  %3407 = vmatpush3.msra.mxu1 %v3076_v40  ;;  %v3090_v40 = vld [vmem:[%s4231_s3 + $0x140] sm:$0xff] }
 0xa66   : > { %3408 = vmatprep.subr.mxu1 %v3567_v7 }
 0xa67   : > { %3409 = vmatpush3.msra.mxu1 %v3075_v42 }
 0xa68   : > { %3410 = vmatprep.subr.mxu1 %v3567_v7 }
 0xa69   : > { %3411 = vmatpush3.msra.mxu1 %v3074_v44 }
 0xa6a   : > { %3412 = vmatprep.subr.mxu1 %v3567_v7 }
 0xa6b   : > { %3413 = vmatpush3.msra.mxu1 %v3073_v46 }
 0xa6c   : > { %3422 = vmatprep.subr.mxu1 %v3567_v7 }
 0xb24   : > { %v1530_v29 = vpop.f32.mrf.mxu1 }
 0xb25   : > { %v1531_v30 = vadd.f32 %v3057_v28, %v1530_v29 }
 0xb26   : > { %v3383_v31 = vpop.f32.mrf.mxu1 }
 0xb27   : > { %v1534_v32 = vadd.f32 %v1531_v30, %v1359_v9 }
 0xb29   : > { %v1537_v33 = vsel %vm338_vm0, %v1534_v32, 0.0 }
 0xb2a   : > { %1538 = vadd.xlane.f32.xlu0 %v1537_v33 }
 0xbb3   : > { %v1539_v34 = vpop.xlane.xlu0 %1538 }
 0xbb4   : > { %v1540_v35 = vmul.f32 0.03125, %v1539_v34 }
 0xbb6   : > { %v1541_v36 = vsub.f32 %v1534_v32, %v1540_v35 }
 0xbb8   : > { %v1542_v37 = vmul.f32 %v1541_v36, %v1541_v36 }
 0xbba   : > { %v1543_v38 = vsel %vm338_vm0, %v1542_v37, 0.0  ;;  %v3093_v37 = vld [vmem:[%s4231_s3 + $0x158] sm:$0xff] }
 0xbbb   : > { %1544 = vadd.xlane.f32.xlu1 %v1543_v38  ;;  %v3092_v38 = vld [vmem:[%s4231_s3 + $0x150] sm:$0xff] }
 0xc44   : > { %v1545_v47 = vpop.xlane.xlu1 %1544 }
 0xc45   : > { %v1546_v48 = vmul.f32 0.03125, %v1545_v47  ;;  %v3100_v47 = vld [vmem:[%s4235_s7 + $0x14] ss:$0 sm:$0xff] }
 0xc47   : > { %v1547_v49 = vadd.f32 1e-12, %v1546_v48 }
 0xc49   : > { %3543 = vrsqrt.f32 %v1547_v49 }
 0xc56   : > { %v3544_v50 = vpop.eup %3543 }
 0xc57   : > { %v1549_v52 = vmul.f32 %v3544_v50, %v1541_v36 }
 0xc59   : > { %v1554_v55 = vmul.f32 %v3059_v51, %v1549_v52 }
 0xc5b   : > { %v3953_v57 = vadd.f32 %v3060_v54, %v1554_v55 }
 0xc5d   : > { %3393 = vmatmul.mubr.msk.f32.vlgmr.msra.gmra.mxu0 %vm338_vm0, %v3953_v57  ;;  %3415 = vmatmul.mubr.msk.f32.vlgmr.msra.gmra.mxu1 %vm338_vm0, %v3953_v57 }
 0xc5e   : > { %3396 = vmatpush3.msra.mxu0 %v3070_v58  ;;  %3403 = vmatprep.mubr.msk.f32.mxu0 %vm3568_vm1, %v3567_v7 }
 0xc5f   : > { %3397 = vmatprep.subr.mxu0 %v3567_v7  ;;  %3424 = vmatprep.mubr.msk.f32.mxu1 %vm3568_vm1, %v3567_v7 }
 0xc60   : > { %3398 = vmatpush3.msra.mxu0 %v3069_v60 }
 0xc61   : > { %3399 = vmatprep.subr.mxu0 %v3567_v7 }
 0xc62   : > { %3400 = vmatpush3.msra.mxu0 %v3068_v61 }
 0xc63   : > { %3401 = vmatprep.subr.mxu0 %v3567_v7 }
 0xc64   : > { %3402 = vmatpush3.msra.mxu0 %v3067_v24 }
 0xc65   : > { %3404 = vmatmul.mubr.msk.f32.vlgmr.msra.gmra.mxu0 %vm338_vm0, %v3953_v57  ;;  %3417 = vmatprep.subr.mxu0 %v3567_v7 }
 0xc66   : > { %3419 = vmatprep.mubr.msk.f32.mxu0 %vm3568_vm1, %v3567_v7 }
 0xd1d   : > { %v1639_v63 = vpop.f32.mrf.mxu0  ;;  %v1799_v0 = vpop.f32.mrf.mxu1 }
 0xd1e   : > { %v1800_v1 = vadd.f32 %v3077_v62, %v1799_v0  ;;  %v1640_v10 = vadd.f32 %v3065_v6, %v1639_v63  ;;  %v3106_v0 = vld [vmem:[%s4232_s4 + $0x38] sm:$0xff] }
 0xd1f   : > { %v3394_v2 = vpop.f32.mrf.mxu0  ;;  %v3416_v3 = vpop.f32.mrf.mxu1 }
 0xd20   : > { %3423 = vmatpush3.msra.mxu1 %v1800_v1  ;;  %v3083_v3 = vld [vmem:[%s4232_s4 + $0x28] sm:$0xff] }
 0xd21   : > { %3438 = vmatprep.subr.mxu1 %v3567_v7 }
 0xd25   : > { %v1719_v5 = vpop.f32.mrf.mxu0 }
 0xd26   : > { %v1720_v8 = vadd.f32 %v3071_v4, %v1719_v5  ;;  %v3082_v4 = vld [vmem:[%s4232_s4 + $0x20] sm:$0xff]  ;;  %v3105_v5 = vld [vmem:[%s4232_s4 + $0x30] sm:$0xff] }
 0xd27   : > { %v3405_v9 = vpop.f32.mrf.mxu0 }
 0xd28   : > { %3418 = vmatpush3.xpose.msk.msra.mxu0 %vm605_vm2, %v1720_v8 }
 0xd29   : > { %3427 = vmatprep.subr.mxu0 %v3567_v7 }
 0xd2b   : > { %3420 = vmatmul.mubr.msk.f32.vlgmr.msra.gmra.mxu0 %vm605_vm2, %v1640_v10 }
 0xd2c   : > { %3428 = vmatpush3.msra.mxu0 %v3087_v11  ;;  %3435 = vmatprep.mubr.msk.f32.mxu0 %vm3568_vm1, %v3567_v7 }
 0xd2d   : > { %3429 = vmatprep.subr.mxu0 %v3567_v7 }
 0xd2e   : > { %3430 = vmatpush3.msra.mxu0 %v3086_v12  ;;  %v3109_v12 = vld [vmem:[%s4235_s7 + $0x15] ss:$0 sm:$0xff] }
 0xd2f   : > { %3431 = vmatprep.subr.mxu0 %v3567_v7 }
 0xd30   : > { %3432 = vmatpush3.msra.mxu0 %v3085_v13 }
 0xd31   : > { %3433 = vmatprep.subr.mxu0 %v3567_v7 }
 0xd32   : > { %3434 = vmatpush3.msra.mxu0 %v3084_v14 }
 0xd33   : > { %3436 = vmatmul.mubr.msk.f32.vlgmr.msra.gmra.mxu0 %vm338_vm0, %v3953_v57  ;;  %3449 = vmatprep.subr.mxu0 %v3567_v7 }
 0xd34   : > { %3450 = vmatpush3.msra.mxu0 %v3099_v15  ;;  %3457 = vmatprep.mubr.msk.f32.mxu0 %vm3568_vm1, %v3567_v7 }
 0xd35   : > { %3451 = vmatprep.subr.mxu0 %v3567_v7 }
 0xd36   : > { %3452 = vmatpush3.msra.mxu0 %v3098_v16 }
 0xd37   : > { %3453 = vmatprep.subr.mxu0 %v3567_v7 }
 0xd38   : > { %3454 = vmatpush3.msra.mxu0 %v3097_v17 }
 0xd39   : > { %3455 = vmatprep.subr.mxu0 %v3567_v7 }
 0xd3a   : > { %3456 = vmatpush3.msra.mxu0 %v3096_v18 }
 0xd3b   : > { %3458 = vmatmul.mubr.msk.f32.vlgmr.msra.gmra.mxu0 %vm338_vm0, %v3953_v57  ;;  %3470 = vmatprep.subr.mxu0 %v3567_v7 }
 0xd3c   : > { %3474 = vmatprep.mubr.msk.f32.mxu0 %vm3568_vm1, %v3567_v7  ;;  %3471 = vmatpush3.msra.mxu0 %v3106_v0 }
 0xd3d   : > { %3472 = vmatprep.subr.mxu0 %v3567_v7 }
 0xd3e   : > { %3473 = vmatpush3.msra.mxu0 %v3105_v5  ;;  %v2755_v5 = vld [vmem:[%s4234_s6 + $0x20] sm:$0xff] }
 0xd3f   : > { %3484 = vmatprep.subr.mxu0 %v3567_v7 }
 0xdeb   : > { %v1875_v19 = vpop.f32.mrf.mxu0 }
 0xdec   : > { %v1879_v20 = vmul.f32 0.25, %v1875_v19 }
 0xded   : > { %v3421_v21 = vpop.f32.mrf.mxu0 }
 0xdee   : > { %v1880_v22 = vadd.f32 %v1879_v20, %v3770_v59 }
 0xdf0   : > { %v1881_v23 = vsel %vm690_vm3, %v1880_v22, -inf }
 0xdf1   : > { %1882 = vmax.xlane.f32.xlu0 %v1881_v23  ;;  %v3115_v23 = vld [vmem:[%s4233_s5 + $0x78] sm:$0xff] }
 0xdf3   : > { %v2044_v25 = vpop.f32.mrf.mxu0 }
 0xdf4   : > { %v2045_v49 = vadd.f32 %v3088_v45, %v2044_v25  ;;  %v3113_v25 = vld [vmem:[%s4233_s5 + $0x68] sm:$0xff] }
 0xdf5   : > { %v3437_v26 = vpop.f32.mrf.mxu0 }
 0xdf6   : > { %v3112_v26 = vld [vmem:[%s4233_s5 + $0x60] sm:$0xff] }
 0xdfb   : > { %v2204_v27 = vpop.f32.mrf.mxu0 }
 0xdfc   : > { %v2205_v50 = vadd.f32 %v3100_v47, %v2204_v27 }
 0xdfd   : > { %v3459_v28 = vpop.f32.mrf.mxu0 }
 0xe7a   : > { %v1883_v29 = vpop.xlane.xlu0 %1882 }
 0xe7b   : > { %v1884_v30 = vsub.f32 %v1880_v22, %v1883_v29 }
 0xe7d   : > { %v1885_v31 = vmul.f32 1.442695, %v1884_v30 }
 0xe7f   : > { %3545 = vpow2.f32 %v1885_v31  ;;  %v3110_v31 = vld [vmem:[%s4235_s7 + $0x16] ss:$0 sm:$0xff] }
 0xe8c   : > { %v3546_v32 = vpop.eup %3545 }
 0xe8d   : > { %v1887_v33 = vsel %vm690_vm3, %v3546_v32, 0.0 }
 0xe8e   : > { %1888 = vadd.xlane.f32.xlu1 %v1887_v33  ;;  %v3111_v33 = vld [vmem:[%s4235_s7 + $0x17] ss:$0 sm:$0xff] }
 0xf17   : > { %v1889_v34 = vpop.xlane.xlu1 %1888 }
 0xf18   : > { %3547 = vrcp.f32 %v1889_v34 }
 0xf25   : > { %v3548_v35 = vpop.eup %3547 }
 0xf26   : > { %v1891_v36 = vmul.f32 %v3548_v35, %v3546_v32 }
 0xf28   : > { %3425 = vmatmul.mubr.msk.f32.vlgmr.msra.gmra.mxu1 %vm690_vm3, %v1891_v36  ;;  %v3125_v36 = vld [vmem:[%s4233_s5 + $0xb8] sm:$0xff] }
 0xf29   : > { %3439 = vmatpush3.msra.mxu1 %v3093_v37  ;;  %3446 = vmatprep.mubr.msk.f32.mxu1 %vm3568_vm1, %v3567_v7  ;;  %v3124_v37 = vld [vmem:[%s4233_s5 + $0xb0] sm:$0xff] }
 0xf2a   : > { %3440 = vmatprep.subr.mxu1 %v3567_v7 }
 0xf2b   : > { %3441 = vmatpush3.msra.mxu1 %v3092_v38  ;;  %v3123_v38 = vld [vmem:[%s4233_s5 + $0xa8] sm:$0xff] }
 0xf2c   : > { %3442 = vmatprep.subr.mxu1 %v3567_v7 }
 0xf2d   : > { %3443 = vmatpush3.msra.mxu1 %v3091_v39  ;;  %v3122_v39 = vld [vmem:[%s4233_s5 + $0xa0] sm:$0xff] }
 0xf2e   : > { %3444 = vmatprep.subr.mxu1 %v3567_v7 }
 0xf2f   : > { %3445 = vmatpush3.msra.mxu1 %v3090_v40  ;;  %v3121_v40 = vld [vmem:[%s4233_s5 + $0x98] sm:$0xff] }
 0xf30   : > { %3447 = vmatmul.mubr.msk.f32.vlgmr.msra.gmra.mxu1 %vm338_vm0, %v3953_v57  ;;  %3460 = vmatprep.subr.mxu1 %v3567_v7 }
 0xf31   : > { %3462 = vmatprep.mubr.msk.f32.mxu1 %vm3568_vm1, %v3567_v7 }
 0xfe8   : > { %v1961_v41 = vpop.f32.mrf.mxu1 }
 0xfea   : > { %v3426_v42 = vpop.f32.mrf.mxu1 }
 0xfeb   : > { %v3119_v42 = vld [vmem:[%s4233_s5 + $0x88] sm:$0xff] }
 0xff0   : > { %v2124_v44 = vpop.f32.mrf.mxu1 }
 0xff1   : > { %v2125_v46 = vadd.f32 %v3094_v43, %v2124_v44  ;;  %v3118_v43 = vld [vmem:[%s4233_s5 + $0x80] sm:$0xff]  ;;  %v3116_v44 = vld [vmem:[%s4235_s7 + $0x18] ss:$0 sm:$0xff] }
 0xff2   : > { %v3448_v48 = vpop.f32.mrf.mxu1 }
 0xff3   : > { %3461 = vmatpush3.xpose.msk.msra.mxu1 %vm605_vm2, %v2125_v46 }
 0xff4   : > { %3465 = vmatprep.subr.mxu1 %v3567_v7 }
 0xff6   : > { %3463 = vmatmul.mubr.msk.f32.vlgmr.msra.gmra.mxu1 %vm605_vm2, %v2045_v49 }
 0xff7   : > { %3466 = vmatpush3.msra.mxu1 %v2205_v50  ;;  %3467 = vmatprep.mubr.msk.f32.mxu1 %vm3568_vm1, %v3567_v7 }
 0xff8   : > { %3477 = vmatprep.subr.mxu1 %v3567_v7 }
0x10b6   : > { %v2280_v51 = vpop.f32.mrf.mxu1 }
0x10b7   : > { %v2284_v52 = vmul.f32 0.25, %v2280_v51 }
0x10b8   : > { %v3464_v54 = vpop.f32.mrf.mxu1 }
0x10b9   : > { %v2285_v55 = vadd.f32 %v2284_v52, %v3770_v59  ;;  %v3126_v54 = vld [vmem:[%s4235_s7 + $0x19] ss:$0 sm:$0xff] }
0x10bb   : > { %v2286_v58 = vsel %vm690_vm3, %v2285_v55, -inf }
0x10bc   : > { %2287 = vmax.xlane.f32.xlu0 %v2286_v58 }
0x1145   : > { %v2288_v60 = vpop.xlane.xlu0 %2287 }
0x1146   : > { %v2289_v61 = vsub.f32 %v2285_v55, %v2288_v60 }
0x1148   : > { %v2290_v24 = vmul.f32 1.442695, %v2289_v61 }
0x114a   : > { %3549 = vpow2.f32 %v2290_v24 }
0x1157   : > { %v3550_v62 = vpop.eup %3549 }
0x1158   : > { %v2292_v63 = vsel %vm690_vm3, %v3550_v62, 0.0 }
0x1159   : > { %2293 = vadd.xlane.f32.xlu1 %v2292_v63 }
0x11e2   : > { %v2294_v1 = vpop.xlane.xlu1 %2293 }
0x11e3   : > { %3551 = vrcp.f32 %v2294_v1 }
0x11f0   : > { %v3552_v59 = vpop.eup %3551 }
0x11f1   : > { %v2296_v2 = vmul.f32 %v3552_v59, %v3550_v62 }
0x11f3   : > { %3468 = vmatmul.mubr.msk.f32.vlgmr.msra.gmra.mxu1 %vm690_vm3, %v2296_v2  ;;  %v2758_v2 = vld [vmem:[%s4234_s6 + $0x38] sm:$0xff] }
0x11f4   : > { %3478 = vmatpush3.msra.mxu1 %v3083_v3  ;;  %3481 = vmatprep.mubr.msk.f32.mxu1 %vm3568_vm1, %v3567_v7  ;;  %v2757_v3 = vld [vmem:[%s4234_s6 + $0x30] sm:$0xff] }
0x11f5   : > { %3479 = vmatprep.subr.mxu1 %v3567_v7 }
0x11f6   : > { %3480 = vmatpush3.msra.mxu1 %v3082_v4  ;;  %v2756_v4 = vld [vmem:[%s4234_s6 + $0x28] sm:$0xff] }
0x11f7   : > { %3482 = vmatmul.mubr.msk.f32.vlgmr.msra.gmra.mxu1 %vm605_vm2, %v1961_v41  ;;  %3495 = vmatprep.subr.mxu1 %v3567_v7  ;;  %v3120_v41 = vld [vmem:[%s4233_s5 + $0x90] sm:$0xff] }
0x11f8   : > { %3511 = vmatprep.mubr.msk.f32.mxu1 %vm3568_vm1, %v3567_v7  ;;  %3496 = vmatpush3.msra.mxu1 %v3125_v36 }
0x11f9   : > { %3497 = vmatprep.subr.mxu1 %v3567_v7 }
0x11fa   : > { %3498 = vmatpush3.msra.mxu1 %v3124_v37 }
0x11fb   : > { %3499 = vmatprep.subr.mxu1 %v3567_v7 }
0x11fc   : > { %3500 = vmatpush3.msra.mxu1 %v3123_v38 }
0x11fd   : > { %3501 = vmatprep.subr.mxu1 %v3567_v7 }
0x11fe   : > { %3502 = vmatpush3.msra.mxu1 %v3122_v39 }
0x11ff   : > { %3503 = vmatprep.subr.mxu1 %v3567_v7 }
0x1200   : > { %3504 = vmatpush3.msra.mxu1 %v3121_v40 }
0x1201   : > { %3505 = vmatprep.subr.mxu1 %v3567_v7 }
0x1202   : > { %3506 = vmatpush3.msra.mxu1 %v3120_v41 }
0x1203   : > { %3507 = vmatprep.subr.mxu1 %v3567_v7 }
0x1204   : > { %3508 = vmatpush3.msra.mxu1 %v3119_v42 }
0x1205   : > { %3509 = vmatprep.subr.mxu1 %v3567_v7 }
0x1206   : > { %3510 = vmatpush3.msra.mxu1 %v3118_v43 }
0x12b3   : > { %v2366_v6 = vpop.f32.mrf.mxu1 }
0x12b4   : > { %3475 = vmatmul.mubr.msk.f32.vlgmr.msra.gmra.mxu0 %vm605_vm2, %v2366_v6  ;;  %v2754_v6 = vld [vmem:[%s4234_s6 + $0x18] sm:$0xff] }
0x12b5   : > { %v3469_v8 = vpop.f32.mrf.mxu1  ;;  %3492 = vmatprep.mubr.msk.f32.mxu0 %vm3568_vm1, %v3567_v7  ;;  %3485 = vmatpush3.msra.mxu0 %v3115_v23 }
0x12b6   : > { %3486 = vmatprep.subr.mxu0 %v3567_v7  ;;  %v2753_v8 = vld [vmem:[%s4234_s6 + $0x10] sm:$0xff] }
0x12b7   : > { %v2515_v9 = vpop.f32.mrf.mxu1 }
0x12b9   : > { %v3483_v10 = vpop.f32.mrf.mxu1 }
0x12ba   : > { %v2751_v10 = vld [vmem:[%s4234_s6] sm:$0xff] }
0x1374   : > { %v2442_v11 = vpop.f32.mrf.mxu0 }
0x1375   : > { %v2516_v13 = vadd.f32 %v2515_v9, %v2442_v11  ;;  %v2752_v9 = vld [vmem:[%s4234_s6 + $0x8] sm:$0xff] }
0x1376   : > { %v3476_v14 = vpop.f32.mrf.mxu0 }
0x1377   : > { %v2524_v15 = vadd.f32 %v3109_v12, %v2516_v13 }
0x1379   : > { %v2525_v16 = vadd.f32 %v2524_v15, %v3953_v57  ;;  %v3114_v57 = vld [vmem:[%s4233_s5 + $0x70] sm:$0xff]  ;;  %v3128_v15 = vld [vmem:[%s4235_s7 + $0x1a] ss:$0 sm:$0xff] }
0x137a   : > { %3487 = vmatpush3.msra.mxu0 %v3114_v57 }
0x137b   : > { %v2528_v17 = vsel %vm338_vm0, %v2525_v16, 0.0  ;;  %3488 = vmatprep.subr.mxu0 %v3567_v7 }
0x137c   : > { %2529 = vadd.xlane.f32.xlu0 %v2528_v17  ;;  %3489 = vmatpush3.msra.mxu0 %v3113_v25  ;;  %v3129_v17 = vld [vmem:[%s4235_s7 + $0x1b] ss:$0 sm:$0xff]  ;;  %v2921_v25 = vld [vmem:[%s327_s10] sm:$0xff] }
0x137d   : > { %3490 = vmatprep.subr.mxu0 %v3567_v7  ;;  %vm2922_vm6 = vcmp.eq.f32.partialorder %v2921_v25, 0.0 }
0x137e   : > { %3491 = vmatpush3.msra.mxu0 %v3112_v26 }
0x137f   : > { %2786 = vmatprep.subr.mxu0 %v2758_v2 }
0x1405   : > { %v2530_v18 = vpop.xlane.xlu0 %2529 }
0x1406   : > { %v2531_v19 = vmul.f32 0.03125, %v2530_v18 }
0x1408   : > { %v2532_v20 = vsub.f32 %v2525_v16, %v2531_v19 }
0x140a   : > { %v2533_v21 = vmul.f32 %v2532_v20, %v2532_v20 }
0x140c   : > { %v2534_v22 = vsel %vm338_vm0, %v2533_v21, 0.0 }
0x140d   : > { %2535 = vadd.xlane.f32.xlu1 %v2534_v22 }
0x1496   : > { %v2536_v27 = vpop.xlane.xlu1 %2535 }
0x1497   : > { %v2537_v28 = vmul.f32 0.03125, %v2536_v27 }
0x1499   : > { %v2538_v29 = vadd.f32 1e-12, %v2537_v28 }
0x149b   : > { %3553 = vrsqrt.f32 %v2538_v29 }
0x14a8   : > { %v3554_v30 = vpop.eup %3553 }
0x14a9   : > { %v2540_v32 = vmul.f32 %v3554_v30, %v2532_v20  ;;  %v2836_v20 = vand.u32 127, %v684_v53  ;;  %v3133_v53 = vld [vmem:[%s4235_s7 + $0x1c] ss:$0 sm:$0xff] }
0x14ab   : > { %v2545_v34 = vmul.f32 %v3110_v31, %v2540_v32  ;;  %v2837_v21 = vadd.s32 1, %v2836_v20 }
0x14ad   : > { %v2550_v35 = vadd.f32 %v3111_v33, %v2545_v34  ;;  %vm2838_vm5 = vcmp.eq.s32.totalorder %v3767_v56, %v2837_v21 }
0x14ae   : > { %v3131_v23 = vsel %vm2838_vm5, 1.0, %v3567_v7 }
0x14af   : > { %3493 = vmatmul.mubr.msk.f32.vlgmr.msra.gmra.mxu0 %vm338_vm0, %v2550_v35 }
0x14b0   : > { %2826 = vmatprep.mubr.f32.mxu0 %v3567_v7  ;;  %2787 = vmatpush1.msra.mxu0 %v2757_v3 }
0x14b1   : > { %2788 = vmatprep.subr.mxu0 %v2756_v4 }
0x14b2   : > { %2789 = vmatpush1.msra.mxu0 %v2755_v5 }
0x14b3   : > { %2790 = vmatprep.subr.mxu0 %v2754_v6 }
0x14b4   : > { %2791 = vmatpush1.msra.mxu0 %v2753_v8 }
0x14b5   : > { %2792 = vmatprep.subr.mxu0 %v2752_v9 }
0x14b6   : > { %2793 = vmatpush1.msra.mxu0 %v2751_v10 }
0x14b7   : > { %3514 = vmatprep.subr.mxu0 %v3567_v7 }
0x156f   : > { %v2630_v45 = vpop.f32.mrf.mxu0 }
0x1570   : > { %v2631_v46 = vadd.f32 %v3116_v44, %v2630_v45 }
0x1571   : > { %v3494_v47 = vpop.f32.mrf.mxu0 }
0x1572   : > { %v2635_v48 = vmul.f32 0.70710677, %v2631_v46  ;;  %v2634_v50 = vmul.f32 0.5, %v2631_v46 }
0x1574   : > { %3555 = verf.f32 %v2635_v48 }
0x1581   : > { %v3556_v49 = vpop.eup %3555 }
0x1582   : > { %v2637_v51 = vadd.f32 1.0, %v3556_v49 }
0x1584   : > { %v2638_v52 = vmul.f32 %v2637_v51, %v2634_v50 }
0x1586   : > { %3512 = vmatmul.mubr.msk.f32.vlgmr.msra.gmra.mxu1 %vm1460_vm4, %v2638_v52 }
0x1646   : > { %v2721_v55 = vpop.f32.mrf.mxu1 }
0x1647   : > { %v2722_v58 = vadd.f32 %v3126_v54, %v2721_v55 }
0x1648   : > { %v3513_v60 = vpop.f32.mrf.mxu1 }
0x1649   : > { %v2725_v61 = vadd.f32 %v2722_v58, %v2550_v35 }
0x164b   : > { %v2728_v24 = vsel %vm338_vm0, %v2725_v61, 0.0 }
0x164c   : > { %2729 = vadd.xlane.f32.xlu0 %v2728_v24 }
0x16d5   : > { %v2730_v62 = vpop.xlane.xlu0 %2729 }
0x16d6   : > { %v2731_v63 = vmul.f32 0.03125, %v2730_v62 }
0x16d8   : > { %v2732_v0 = vsub.f32 %v2725_v61, %v2731_v63 }
0x16da   : > { %v2733_v1 = vmul.f32 %v2732_v0, %v2732_v0 }
0x16dc   : > { %v2734_v59 = vsel %vm338_vm0, %v2733_v1, 0.0 }
0x16dd   : > { %2735 = vadd.xlane.f32.xlu1 %v2734_v59 }
0x1766   : > { %v2736_v11 = vpop.xlane.xlu1 %2735 }
0x1767   : > { %v2737_v12 = vmul.f32 0.03125, %v2736_v11 }
0x1769   : > { %v2738_v13 = vadd.f32 1e-12, %v2737_v12 }
0x176b   : > { %3557 = vrsqrt.f32 %v2738_v13 }
0x1778   : > { %v3558_v14 = vpop.eup %3557 }
0x1779   : > { %v2740_v16 = vmul.f32 %v3558_v14, %v2732_v0 }
0x177b   : > { %v2745_v18 = vmul.f32 %v3128_v15, %v2740_v16 }
0x177d   : > { %v2750_v19 = vadd.f32 %v3129_v17, %v2745_v18 }
0x177f   : > { %3130 = vmatmul.mubr.msk.f32.vlgmr.msra.gmra.mxu0 %vm338_vm0, %v2750_v19 }
0x1780   : > { %3516 = vmatprep.mubr.msk.f32.mxu0 %vm3568_vm1, %v3567_v7 }
0x183f   : > { %v2828_v22 = vpop.f32.mrf.mxu0 }
0x1841   : > { %v2830_v57 = vpop.f32.mrf.mxu0 }
0x1842   : > { %3515 = vmatpush3.msra.mxu0 %v2830_v57 }
0x1843   : > { %3517 = vmatmul.mubr.msk.f32.vlgmr.msra.gmra.mxu0 %vm690_vm3, %v3131_v23 }
0x1903   : > { %v2910_v26 = vpop.f32.mrf.mxu0 }
0x1904   : > { %v2914_v27 = vadd.f32 %v2910_v26, %v2828_v22 }
0x1905   : > { %v3518_v56 = vpop.f32.mrf.mxu0 }
0x1906   : > { %v2920_v7 = vadd.f32 %v3133_v53, %v2914_v27 }
0x1908   : > { %v2923_v28 = vsel %vm2922_vm6, %v2920_v7, -inf }
0x1909   : > { %2924 = vst [vmem:[%s331_s15] sm:$0xff] %v2923_v28 }
0x190a PF: > { %s18_s27 = sadd.s32 1, %s3565_s27  }
0x190b   : > { %p15_p4 = scmp.ge.s32.totalorder %s18_s27, 4  }
0x190d   :  { %17 = sbr.rel (!%p15_p4) target bundleno = 1 (0x1), region = 103 }

</bundles_post_ra>
